<compile_context>
chip_gen: v7x
topology: tpu7x:2x2x1
jax: 0.10.0
libtpu: 0.0.40
codegen_flags: <defaults>
</compile_context>

<pallas_src>
import jax
import jax.numpy as jnp
from jax.experimental import pallas as pl
from jax.experimental.pallas import tpu as pltpu

# ---------------------------------------------------------------------------
# Configuration (small, deterministic shapes).
# ---------------------------------------------------------------------------
B = 2            # batch
C_IN = 3         # image channels
H = W = 16       # spatial
HW = H * W
FEAT = 128       # backbone feature dim (self.in_ch of the image net)
N_META = 8       # n_meta_features
META_D0 = 64     # n_meta_dim[0]
META_D1 = 32     # n_meta_dim[1]
OUT_DIM = 10     # out_dim
BN_EPS = 1e-5
IN_CH_TOT = FEAT + META_D1        # self.in_ch after meta concat (=160)

# Padded (lane/sublane friendly) sizes used inside the kernel.
B_PAD = 8                          # batch rows padded to a full sublane group
K_STEM = 9 * C_IN                  # 27 (3x3 im2col)
K_STEM_PAD = 128                   # stem reduction dim padded (lane-dense)
META_IN_PAD = 128                  # n_meta_features padded to full lanes
META_HID_PAD = 128                 # holds META_D0 = 64
META_OUT_PAD = 128                 # holds META_D1 = 32
CAT_PAD = FEAT + META_OUT_PAD      # 256 -- lane-dense x_cat slab
OUT_PAD = 128                      # lane-dense output slab
SLAB_PAD = CAT_PAD + OUT_PAD       # single merged output slab (384 lanes)
STEM_CHUNK = 128                   # stem rows processed per unrolled step

MATMUL_DTYPE = jnp.bfloat16        # MXU operand dtype (f32 accumulation)


def _pick_stem_epilogue_dtype():
    """bf16 stem SiLU epilogue on v6e/v7x (bf16 VPU/EUP); f32 elsewhere."""
    try:
        kind = jax.devices()[0].device_kind.lower()
    except Exception:
        return jnp.float32
    if ("v6" in kind) or ("v7" in kind) or ("7x" in kind):
        return jnp.bfloat16
    return jnp.float32


STEM_EPILOGUE_DTYPE = _pick_stem_epilogue_dtype()


def _silu(x):
    return x * jax.nn.sigmoid(x)


def _vmem_spec():
    return pl.BlockSpec(memory_space=pltpu.MemorySpace.VMEM)


# ---------------------------------------------------------------------------
# Single fused kernel: backbone stand-in + meta MLP + concat + myfc head.
# All intermediates (feat, x_meta_out, x_cat) stay resident in VMEM/vregs.
# ---------------------------------------------------------------------------
def fused_kernel(patches_ref,   # (B*HW, K_STEM_PAD)      bf16
                 w_stem_ref,    # (K_STEM_PAD, FEAT)      bf16
                 b_stem_ref,    # (1, FEAT)               f32
                 xmeta_ref,     # (B_PAD, META_IN_PAD)    bf16
                 w1_ref,        # (META_IN_PAD, META_HID_PAD)  bf16 (BN folded)
                 t1_ref,        # (1, META_HID_PAD)       f32
                 w2_ref,        # (META_HID_PAD, META_OUT_PAD) bf16 (BN folded)
                 t2_ref,        # (1, META_OUT_PAD)       f32
                 wfc_ref,       # (CAT_PAD, CAT_PAD)      bf16 (BN folded)
                 tfc_ref,       # (1, CAT_PAD)            f32
                 wout_ref,      # (CAT_PAD, OUT_PAD)      bf16
                 bout_ref,      # (1, OUT_PAD)            f32
                 slab_ref):     # (B_PAD, SLAB_PAD)       f32   [x_cat | out]
    epi_dt = STEM_EPILOGUE_DTYPE
    w_stem = w_stem_ref[...]                          # hoisted single read
    b_stem = b_stem_ref[...].astype(epi_dt)
    inv_hw = jnp.float32(1.0 / HW)

    # --- backbone stand-in: chunked conv-stem matmul + SiLU + GAP -----------
    # Chunking over STEM_CHUNK rows bounds the live stem activation to
    # ~16 vregs; the pool is a cheap cross-sublane sum (VPU/XLU), not an MXU
    # pass, so the f32->bf16 cast of the big activation disappears entirely.
    row_ids = jax.lax.broadcasted_iota(jnp.int32, (B_PAD, 1), 0)
    feat = jnp.zeros((B_PAD, FEAT), jnp.float32)
    for b in range(B):
        acc = jnp.zeros((1, FEAT), jnp.float32)
        for j in range(HW // STEM_CHUNK):
            r0 = b * HW + j * STEM_CHUNK               # static row offset
            hc = jnp.dot(patches_ref[pl.ds(r0, STEM_CHUNK), :], w_stem,
                         preferred_element_type=jnp.float32)   # (128, FEAT)
            hc = _silu(hc.astype(epi_dt) + b_stem)
            acc = acc + jnp.sum(hc.astype(jnp.float32), axis=0, keepdims=True)
        feat = jnp.where(row_ids == b, acc * inv_hw, feat)      # (B_PAD, FEAT)

    # --- meta MLP: Linear(+BN folded) -> SiLU -> Linear(+BN folded) -> SiLU ---
    m = jnp.dot(xmeta_ref[...], w1_ref[...],
                preferred_element_type=jnp.float32)
    m = _silu(m + t1_ref[...])                                  # (B_PAD, 128)
    m = jnp.dot(m.astype(MATMUL_DTYPE), w2_ref[...],
                preferred_element_type=jnp.float32)
    m = _silu(m + t2_ref[...])                                  # (B_PAD, 128)

    # --- concat (lanes 0..127 = feat, 128..159 = meta, 160..255 = zeros) ---
    xcat = jnp.concatenate([feat, m], axis=-1)                  # (B_PAD, 256)

    # --- myfc head (eval-mode 5-way dropout average == single pass) ---
    hfc = jnp.dot(xcat.astype(MATMUL_DTYPE), wfc_ref[...],
                  preferred_element_type=jnp.float32)
    hfc = _silu(hfc + tfc_ref[...])                             # (B_PAD, 256)
    out = jnp.dot(hfc.astype(MATMUL_DTYPE), wout_ref[...],
                  preferred_element_type=jnp.float32)           # (B_PAD, 128)
    out = out + bout_ref[...]

    # --- single lane-dense output slab: [x_cat | out] -----------------------
    slab_ref[...] = jnp.concatenate([xcat, out], axis=-1)       # (B_PAD, 384)


def fused_forward(patches, xmeta_pad, p):
    args = (patches, p["w_stem"], p["b_stem"],
            xmeta_pad, p["w1"], p["t1"], p["w2"], p["t2"],
            p["wfc"], p["tfc"], p["wout"], p["bout"])

    rows = B * HW
    flops = 2 * (rows * K_STEM_PAD * FEAT          # stem matmul
                 + B_PAD * META_IN_PAD * META_HID_PAD
                 + B_PAD * META_HID_PAD * META_OUT_PAD
                 + B_PAD * CAT_PAD * CAT_PAD
                 + B_PAD * CAT_PAD * OUT_PAD) + rows * FEAT   # + VPU pool
    transcendentals = (rows * FEAT + B_PAD * META_HID_PAD
                       + B_PAD * META_OUT_PAD + B_PAD * CAT_PAD)
    bytes_accessed = (sum(int(a.size) * a.dtype.itemsize for a in args)
                      + B_PAD * SLAB_PAD * 4)

    return pl.pallas_call(
        fused_kernel,
        out_shape=jax.ShapeDtypeStruct((B_PAD, SLAB_PAD), jnp.float32),
        in_specs=[_vmem_spec()] * len(args),
        out_specs=_vmem_spec(),
        cost_estimate=pl.CostEstimate(flops=flops,
                                      transcendentals=transcendentals,
                                      bytes_accessed=bytes_accessed),
    )(*args)


# ---------------------------------------------------------------------------
# Glue: im2col (bf16), BN folding + padding, parameter init, full forward.
# ---------------------------------------------------------------------------
def im2col_3x3_same(x_nhwc):
    """(B, H, W, C) -> (B, H*W, 9*C) patches for a 3x3 / stride-1 / SAME conv."""
    b, h, w, c = x_nhwc.shape
    xp = jnp.pad(x_nhwc, ((0, 0), (1, 1), (1, 1), (0, 0)))
    cols = []
    for dh in range(3):
        for dw in range(3):
            cols.append(xp[:, dh:dh + h, dw:dw + w, :])
    patches = jnp.concatenate(cols, axis=-1)          # (B, H, W, 9*C)
    return patches.reshape(b, h * w, 9 * c)


def fold_bn_into_linear(w, bias, gamma, beta, mean, var):
    """Fold eval-mode BatchNorm1d into the preceding Linear:
       BN(xW + b) == x @ (W * scale) + ((b - mean) * scale + beta)."""
    scale = gamma / jnp.sqrt(var + BN_EPS)
    return w * scale[None, :], (bias - mean) * scale + beta


def _bn_stats(key, n):
    k = jax.random.split(key, 4)
    gamma = 1.0 + 0.1 * jax.random.normal(k[0], (n,), jnp.float32)
    beta = 0.1 * jax.random.normal(k[1], (n,), jnp.float32)
    mean = 0.1 * jax.random.normal(k[2], (n,), jnp.float32)
    var = 1.0 + 0.1 * jax.nn.softplus(jax.random.normal(k[3], (n,), jnp.float32))
    return gamma, beta, mean, var


def _pad2(x, rows, cols):
    return jnp.pad(x, ((0, rows - x.shape[0]), (0, cols - x.shape[1])))


def init_params(key):
    ks = jax.random.split(key, 12)
    p = {}

    # backbone conv stem (reduction dim padded 27 -> 128 for lane-dense loads)
    w_stem = jax.random.normal(ks[0], (K_STEM, FEAT), jnp.float32) * 0.05
    p["w_stem"] = _pad2(w_stem, K_STEM_PAD, FEAT).astype(MATMUL_DTYPE)
    p["b_stem"] = (jax.random.normal(ks[1], (FEAT,), jnp.float32) * 0.01)[None, :]

    # meta layer 1: Linear(N_META, META_D0) + BN (folded), padded to 128x128
    w1 = jax.random.normal(ks[2], (N_META, META_D0), jnp.float32) * 0.1
    b1 = jax.random.normal(ks[3], (META_D0,), jnp.float32) * 0.01
    w1f, t1 = fold_bn_into_linear(w1, b1, *_bn_stats(ks[4], META_D0))
    p["w1"] = _pad2(w1f, META_IN_PAD, META_HID_PAD).astype(MATMUL_DTYPE)
    p["t1"] = jnp.pad(t1, (0, META_HID_PAD - META_D0))[None, :]

    # meta layer 2: Linear(META_D0, META_D1) + BN (folded), padded to 128x128
    w2 = jax.random.normal(ks[5], (META_D0, META_D1), jnp.float32) * 0.1
    b2 = jax.random.normal(ks[6], (META_D1,), jnp.float32) * 0.01
    w2f, t2 = fold_bn_into_linear(w2, b2, *_bn_stats(ks[7], META_D1))
    p["w2"] = _pad2(w2f, META_HID_PAD, META_OUT_PAD).astype(MATMUL_DTYPE)
    p["t2"] = jnp.pad(t2, (0, META_OUT_PAD - META_D1))[None, :]

    # myfc: Linear(160,160) + BN (folded) + SiLU + Dropout, then Linear(160,10)
    wfc = jax.random.normal(ks[8], (IN_CH_TOT, IN_CH_TOT), jnp.float32) * 0.05
    bfc = jax.random.normal(ks[9], (IN_CH_TOT,), jnp.float32) * 0.01
    wfcf, tfc = fold_bn_into_linear(wfc, bfc, *_bn_stats(ks[10], IN_CH_TOT))
    p["wfc"] = _pad2(wfcf, CAT_PAD, CAT_PAD).astype(MATMUL_DTYPE)
    p["tfc"] = jnp.pad(tfc, (0, CAT_PAD - IN_CH_TOT))[None, :]

    kout = jax.random.split(ks[11], 2)
    wout = jax.random.normal(kout[0], (IN_CH_TOT, OUT_DIM), jnp.float32) * 0.1
    bout = jax.random.normal(kout[1], (OUT_DIM,), jnp.float32) * 0.01
    p["wout"] = _pad2(wout, CAT_PAD, OUT_PAD).astype(MATMUL_DTYPE)
    p["bout"] = jnp.pad(bout, (0, OUT_PAD - OUT_DIM))[None, :]
    return p


@jax.jit
def effnet_face_conditions_forward(params, x_nchw, x_meta):
    """Forward pass.  x_nchw: (B, C, H, W) like PyTorch; x_meta: (B, N_META)."""
    # Emit patches directly in bf16: transpose/im2col/pad all stay bf16.
    x_nhwc = jnp.transpose(x_nchw, (0, 2, 3, 1)).astype(MATMUL_DTYPE)
    patches = im2col_3x3_same(x_nhwc).reshape(B * HW, K_STEM)        # (512, 27)
    patches = jnp.pad(patches, ((0, 0), (0, K_STEM_PAD - K_STEM)))   # (512, 128)

    xmeta_pad = jnp.pad(x_meta.astype(jnp.float32),
                        ((0, B_PAD - B), (0, META_IN_PAD - N_META)))
    xmeta_pad = xmeta_pad.astype(MATMUL_DTYPE)                       # (8, 128)

    slab = fused_forward(patches, xmeta_pad, params)                 # (8, 384)

    x_cat = slab[:B, :IN_CH_TOT]                       # (B, IN_CH_TOT)
    out = slab[:B, CAT_PAD:CAT_PAD + OUT_DIM]          # (B, OUT_DIM)
    return out, x_cat                                  # ret_vec_rep=True


if __name__ == "__main__":
    key = jax.random.PRNGKey(0)
    k_param, k_img, k_meta = jax.random.split(key, 3)
    params = init_params(k_param)
    x = jax.random.normal(k_img, (B, C_IN, H, W), jnp.float32)     # NCHW like PyTorch
    x_meta = jax.random.normal(k_meta, (B, N_META), jnp.float32)

    out, vec = effnet_face_conditions_forward(params, x, x_meta)
    jax.block_until_ready((out, vec))
    assert out.shape == (B, OUT_DIM) and vec.shape == (B, IN_CH_TOT)
    assert jnp.all(jnp.isfinite(out)) and jnp.all(jnp.isfinite(vec))
    print("KERNEL_OK")
</pallas_src>

<mosaic_0001>
module attributes {stable_mosaic.version = 11 : i64} {
  func.func @fused_kernel(%arg0: memref<512x128xbf16, #tpu.memory_space<vmem>>, %arg1: memref<128x128xbf16, #tpu.memory_space<vmem>>, %arg2: memref<1x128xf32, #tpu.memory_space<vmem>>, %arg3: memref<8x128xbf16, #tpu.memory_space<vmem>>, %arg4: memref<128x128xbf16, #tpu.memory_space<vmem>>, %arg5: memref<1x128xf32, #tpu.memory_space<vmem>>, %arg6: memref<128x128xbf16, #tpu.memory_space<vmem>>, %arg7: memref<1x128xf32, #tpu.memory_space<vmem>>, %arg8: memref<256x256xbf16, #tpu.memory_space<vmem>>, %arg9: memref<1x256xf32, #tpu.memory_space<vmem>>, %arg10: memref<256x128xbf16, #tpu.memory_space<vmem>>, %arg11: memref<1x128xf32, #tpu.memory_space<vmem>>, %arg12: memref<8x384xf32, #tpu.memory_space<vmem>>) attributes {dimension_semantics = [], scalar_prefetch = 0 : i64, scratch_operands = 0 : i64, tpu.core_type = #tpu.core_type<tc>} {
    %c0 = arith.constant 0 : index
    %c0_0 = arith.constant 0 : index
    %0 = vector.load %arg1[%c0, %c0_0] : memref<128x128xbf16, #tpu.memory_space<vmem>>, vector<128x128xbf16>
    %c0_1 = arith.constant 0 : index
    %c0_2 = arith.constant 0 : index
    %1 = vector.load %arg2[%c0_1, %c0_2] : memref<1x128xf32, #tpu.memory_space<vmem>>, vector<1x128xf32>
    %2 = tpu.iota {dimensions = array<i32: 0>} : vector<8x1xi32>
    %cst = arith.constant 0.000000e+00 : f32
    %3 = vector.broadcast %cst : f32 to vector<8x128xf32>
    %cst_3 = arith.constant 0.000000e+00 : f32
    %4 = vector.broadcast %cst_3 : f32 to vector<1x128xf32>
    %c0_4 = arith.constant 0 : index
    %c0_5 = arith.constant 0 : index
    %5 = vector.load %arg0[%c0_4, %c0_5] : memref<512x128xbf16, #tpu.memory_space<vmem>>, vector<128x128xbf16>
    %cst_6 = arith.constant dense<0.000000e+00> : vector<128x128xf32>
    %6 = tpu.matmul %5, %0, %cst_6 {dimension_numbers = #tpu.dot_dimension_numbers<[1], [0], [0], [1], [0, 0, 1, 1], [], []>} : vector<128x128xbf16>, vector<128x128xbf16>, vector<128x128xf32> -> vector<128x128xf32>
    %7 = vector.broadcast %1 : vector<1x128xf32> to vector<128x128xf32>
    %8 = arith.addf %6, %7 : vector<128x128xf32>
    %9 = arith.negf %8 : vector<128x128xf32>
    %10 = math.exp %9 : vector<128x128xf32>
    %cst_7 = arith.constant 1.000000e+00 : f32
    %11 = vector.broadcast %cst_7 : f32 to vector<128x128xf32>
    %12 = arith.addf %11, %10 : vector<128x128xf32>
    %13 = arith.divf %11, %12 : vector<128x128xf32>
    %14 = arith.mulf %8, %13 : vector<128x128xf32>
    %cst_8 = arith.constant dense<0.000000e+00> : vector<128xf32>
    %15 = vector.multi_reduction <add>, %14, %cst_8 [0] : vector<128x128xf32> to vector<128xf32>
    %16 = vector.shape_cast %15 : vector<128xf32> to vector<1x128xf32>
    %17 = arith.addf %4, %16 : vector<1x128xf32>
    %c128 = arith.constant 128 : index
    %c0_9 = arith.constant 0 : index
    %18 = vector.load %arg0[%c128, %c0_9] : memref<512x128xbf16, #tpu.memory_space<vmem>>, vector<128x128xbf16>
    %cst_10 = arith.constant dense<0.000000e+00> : vector<128x128xf32>
    %19 = tpu.matmul %18, %0, %cst_10 {dimension_numbers = #tpu.dot_dimension_numbers<[1], [0], [0], [1], [0, 0, 1, 1], [], []>} : vector<128x128xbf16>, vector<128x128xbf16>, vector<128x128xf32> -> vector<128x128xf32>
    %20 = vector.broadcast %1 : vector<1x128xf32> to vector<128x128xf32>
    %21 = arith.addf %19, %20 : vector<128x128xf32>
    %22 = arith.negf %21 : vector<128x128xf32>
    %23 = math.exp %22 : vector<128x128xf32>
    %cst_11 = arith.constant 1.000000e+00 : f32
    %24 = vector.broadcast %cst_11 : f32 to vector<128x128xf32>
    %25 = arith.addf %24, %23 : vector<128x128xf32>
    %26 = arith.divf %24, %25 : vector<128x128xf32>
    %27 = arith.mulf %21, %26 : vector<128x128xf32>
    %cst_12 = arith.constant dense<0.000000e+00> : vector<128xf32>
    %28 = vector.multi_reduction <add>, %27, %cst_12 [0] : vector<128x128xf32> to vector<128xf32>
    %29 = vector.shape_cast %28 : vector<128xf32> to vector<1x128xf32>
    %30 = arith.addf %17, %29 : vector<1x128xf32>
    %c0_i32 = arith.constant 0 : i32
    %31 = vector.broadcast %c0_i32 : i32 to vector<8x1xi32>
    %32 = arith.cmpi eq, %2, %31 : vector<8x1xi32>
    %cst_13 = arith.constant 3.906250e-03 : f32
    %33 = vector.broadcast %cst_13 : f32 to vector<1x128xf32>
    %34 = arith.mulf %30, %33 : vector<1x128xf32>
    %35 = vector.shape_cast %32 : vector<8x1xi1> to vector<8x1xi1>
    %36 = vector.broadcast %35 : vector<8x1xi1> to vector<8x128xi1>
    %37 = vector.shape_cast %34 : vector<1x128xf32> to vector<1x128xf32>
    %38 = vector.broadcast %37 : vector<1x128xf32> to vector<8x128xf32>
    %39 = arith.select %36, %38, %3 : vector<8x128xi1>, vector<8x128xf32>
    %cst_14 = arith.constant 0.000000e+00 : f32
    %40 = vector.broadcast %cst_14 : f32 to vector<1x128xf32>
    %c256 = arith.constant 256 : index
    %c0_15 = arith.constant 0 : index
    %41 = vector.load %arg0[%c256, %c0_15] : memref<512x128xbf16, #tpu.memory_space<vmem>>, vector<128x128xbf16>
    %cst_16 = arith.constant dense<0.000000e+00> : vector<128x128xf32>
    %42 = tpu.matmul %41, %0, %cst_16 {dimension_numbers = #tpu.dot_dimension_numbers<[1], [0], [0], [1], [0, 0, 1, 1], [], []>} : vector<128x128xbf16>, vector<128x128xbf16>, vector<128x128xf32> -> vector<128x128xf32>
    %43 = vector.broadcast %1 : vector<1x128xf32> to vector<128x128xf32>
    %44 = arith.addf %42, %43 : vector<128x128xf32>
    %45 = arith.negf %44 : vector<128x128xf32>
    %46 = math.exp %45 : vector<128x128xf32>
    %cst_17 = arith.constant 1.000000e+00 : f32
    %47 = vector.broadcast %cst_17 : f32 to vector<128x128xf32>
    %48 = arith.addf %47, %46 : vector<128x128xf32>
    %49 = arith.divf %47, %48 : vector<128x128xf32>
    %50 = arith.mulf %44, %49 : vector<128x128xf32>
    %cst_18 = arith.constant dense<0.000000e+00> : vector<128xf32>
    %51 = vector.multi_reduction <add>, %50, %cst_18 [0] : vector<128x128xf32> to vector<128xf32>
    %52 = vector.shape_cast %51 : vector<128xf32> to vector<1x128xf32>
    %53 = arith.addf %40, %52 : vector<1x128xf32>
    %c384 = arith.constant 384 : index
    %c0_19 = arith.constant 0 : index
    %54 = vector.load %arg0[%c384, %c0_19] : memref<512x128xbf16, #tpu.memory_space<vmem>>, vector<128x128xbf16>
    %cst_20 = arith.constant dense<0.000000e+00> : vector<128x128xf32>
    %55 = tpu.matmul %54, %0, %cst_20 {dimension_numbers = #tpu.dot_dimension_numbers<[1], [0], [0], [1], [0, 0, 1, 1], [], []>} : vector<128x128xbf16>, vector<128x128xbf16>, vector<128x128xf32> -> vector<128x128xf32>
    %56 = vector.broadcast %1 : vector<1x128xf32> to vector<128x128xf32>
    %57 = arith.addf %55, %56 : vector<128x128xf32>
    %58 = arith.negf %57 : vector<128x128xf32>
    %59 = math.exp %58 : vector<128x128xf32>
    %cst_21 = arith.constant 1.000000e+00 : f32
    %60 = vector.broadcast %cst_21 : f32 to vector<128x128xf32>
    %61 = arith.addf %60, %59 : vector<128x128xf32>
    %62 = arith.divf %60, %61 : vector<128x128xf32>
    %63 = arith.mulf %57, %62 : vector<128x128xf32>
    %cst_22 = arith.constant dense<0.000000e+00> : vector<128xf32>
    %64 = vector.multi_reduction <add>, %63, %cst_22 [0] : vector<128x128xf32> to vector<128xf32>
    %65 = vector.shape_cast %64 : vector<128xf32> to vector<1x128xf32>
    %66 = arith.addf %53, %65 : vector<1x128xf32>
    %c1_i32 = arith.constant 1 : i32
    %67 = vector.broadcast %c1_i32 : i32 to vector<8x1xi32>
    %68 = arith.cmpi eq, %2, %67 : vector<8x1xi32>
    %cst_23 = arith.constant 3.906250e-03 : f32
    %69 = vector.broadcast %cst_23 : f32 to vector<1x128xf32>
    %70 = arith.mulf %66, %69 : vector<1x128xf32>
    %71 = vector.shape_cast %68 : vector<8x1xi1> to vector<8x1xi1>
    %72 = vector.broadcast %71 : vector<8x1xi1> to vector<8x128xi1>
    %73 = vector.shape_cast %70 : vector<1x128xf32> to vector<1x128xf32>
    %74 = vector.broadcast %73 : vector<1x128xf32> to vector<8x128xf32>
    %75 = arith.select %72, %74, %39 : vector<8x128xi1>, vector<8x128xf32>
    %c0_24 = arith.constant 0 : index
    %c0_25 = arith.constant 0 : index
    %76 = vector.load %arg3[%c0_24, %c0_25] : memref<8x128xbf16, #tpu.memory_space<vmem>>, vector<8x128xbf16>
    %c0_26 = arith.constant 0 : index
    %c0_27 = arith.constant 0 : index
    %77 = vector.load %arg4[%c0_26, %c0_27] : memref<128x128xbf16, #tpu.memory_space<vmem>>, vector<128x128xbf16>
    %cst_28 = arith.constant dense<0.000000e+00> : vector<8x128xf32>
    %78 = tpu.matmul %76, %77, %cst_28 {dimension_numbers = #tpu.dot_dimension_numbers<[1], [0], [0], [1], [0, 0, 1, 1], [], []>} : vector<8x128xbf16>, vector<128x128xbf16>, vector<8x128xf32> -> vector<8x128xf32>
    %c0_29 = arith.constant 0 : index
    %c0_30 = arith.constant 0 : index
    %79 = vector.load %arg5[%c0_29, %c0_30] : memref<1x128xf32, #tpu.memory_space<vmem>>, vector<1x128xf32>
    %80 = vector.broadcast %79 : vector<1x128xf32> to vector<8x128xf32>
    %81 = arith.addf %78, %80 : vector<8x128xf32>
    %82 = arith.negf %81 : vector<8x128xf32>
    %83 = math.exp %82 : vector<8x128xf32>
    %cst_31 = arith.constant 1.000000e+00 : f32
    %84 = vector.broadcast %cst_31 : f32 to vector<8x128xf32>
    %85 = arith.addf %84, %83 : vector<8x128xf32>
    %86 = arith.divf %84, %85 : vector<8x128xf32>
    %87 = arith.mulf %81, %86 : vector<8x128xf32>
    %88 = arith.truncf %87 : vector<8x128xf32> to vector<8x128xbf16>
    %c0_32 = arith.constant 0 : index
    %c0_33 = arith.constant 0 : index
    %89 = vector.load %arg6[%c0_32, %c0_33] : memref<128x128xbf16, #tpu.memory_space<vmem>>, vector<128x128xbf16>
    %cst_34 = arith.constant dense<0.000000e+00> : vector<8x128xf32>
    %90 = tpu.matmul %88, %89, %cst_34 {dimension_numbers = #tpu.dot_dimension_numbers<[1], [0], [0], [1], [0, 0, 1, 1], [], []>} : vector<8x128xbf16>, vector<128x128xbf16>, vector<8x128xf32> -> vector<8x128xf32>
    %c0_35 = arith.constant 0 : index
    %c0_36 = arith.constant 0 : index
    %91 = vector.load %arg7[%c0_35, %c0_36] : memref<1x128xf32, #tpu.memory_space<vmem>>, vector<1x128xf32>
    %92 = vector.broadcast %91 : vector<1x128xf32> to vector<8x128xf32>
    %93 = arith.addf %90, %92 : vector<8x128xf32>
    %94 = arith.negf %93 : vector<8x128xf32>
    %95 = math.exp %94 : vector<8x128xf32>
    %cst_37 = arith.constant 1.000000e+00 : f32
    %96 = vector.broadcast %cst_37 : f32 to vector<8x128xf32>
    %97 = arith.addf %96, %95 : vector<8x128xf32>
    %98 = arith.divf %96, %97 : vector<8x128xf32>
    %99 = arith.mulf %93, %98 : vector<8x128xf32>
    %100 = tpu.concatenate %75, %99 in 1 : vector<8x128xf32>, vector<8x128xf32> -> vector<8x256xf32>
    %101 = arith.truncf %100 : vector<8x256xf32> to vector<8x256xbf16>
    %c0_38 = arith.constant 0 : index
    %c0_39 = arith.constant 0 : index
    %102 = vector.load %arg8[%c0_38, %c0_39] : memref<256x256xbf16, #tpu.memory_space<vmem>>, vector<256x256xbf16>
    %cst_40 = arith.constant dense<0.000000e+00> : vector<8x256xf32>
    %103 = tpu.matmul %101, %102, %cst_40 {dimension_numbers = #tpu.dot_dimension_numbers<[1], [0], [0], [1], [0, 0, 1, 1], [], []>} : vector<8x256xbf16>, vector<256x256xbf16>, vector<8x256xf32> -> vector<8x256xf32>
    %c0_41 = arith.constant 0 : index
    %c0_42 = arith.constant 0 : index
    %104 = vector.load %arg9[%c0_41, %c0_42] : memref<1x256xf32, #tpu.memory_space<vmem>>, vector<1x256xf32>
    %105 = vector.broadcast %104 : vector<1x256xf32> to vector<8x256xf32>
    %106 = arith.addf %103, %105 : vector<8x256xf32>
    %107 = arith.negf %106 : vector<8x256xf32>
    %108 = math.exp %107 : vector<8x256xf32>
    %cst_43 = arith.constant 1.000000e+00 : f32
    %109 = vector.broadcast %cst_43 : f32 to vector<8x256xf32>
    %110 = arith.addf %109, %108 : vector<8x256xf32>
    %111 = arith.divf %109, %110 : vector<8x256xf32>
    %112 = arith.mulf %106, %111 : vector<8x256xf32>
    %113 = arith.truncf %112 : vector<8x256xf32> to vector<8x256xbf16>
    %c0_44 = arith.constant 0 : index
    %c0_45 = arith.constant 0 : index
    %114 = vector.load %arg10[%c0_44, %c0_45] : memref<256x128xbf16, #tpu.memory_space<vmem>>, vector<256x128xbf16>
    %cst_46 = arith.constant dense<0.000000e+00> : vector<8x128xf32>
    %115 = tpu.matmul %113, %114, %cst_46 {dimension_numbers = #tpu.dot_dimension_numbers<[1], [0], [0], [1], [0, 0, 1, 1], [], []>} : vector<8x256xbf16>, vector<256x128xbf16>, vector<8x128xf32> -> vector<8x128xf32>
    %c0_47 = arith.constant 0 : index
    %c0_48 = arith.constant 0 : index
    %116 = vector.load %arg11[%c0_47, %c0_48] : memref<1x128xf32, #tpu.memory_space<vmem>>, vector<1x128xf32>
    %117 = vector.broadcast %116 : vector<1x128xf32> to vector<8x128xf32>
    %118 = arith.addf %115, %117 : vector<8x128xf32>
    %119 = tpu.concatenate %100, %118 in 1 : vector<8x256xf32>, vector<8x128xf32> -> vector<8x384xf32>
    %c0_49 = arith.constant 0 : index
    %c0_50 = arith.constant 0 : index
    %120 = vector.load %arg12[%c0_49, %c0_50] : memref<8x384xf32, #tpu.memory_space<vmem>>, vector<8x384xf32>
    tpu.vector_store %arg12[%c0_49, %c0_50], %119 {strides = array<i32>} : memref<8x384xf32, #tpu.memory_space<vmem>>, vector<8x384xf32>,
    return
  }
}

</mosaic_0001>

<bundles_post_ra>
// kernel: effnet_face_conditions_forward.1
= control target key start
LH: loop header
LB: loop body
LE: loop exit
PB: predicated region body
PF: predicated region fallthrough
CT: control target
= control target key end

     0   :  { %v2831_v30 = vmov 0.0   ;;  %vm2832_vm0 = vmmov 0   ;;  %s3804_s1 = inlined_call_operand.vmem [shape: bf16[128,128], index: 1, kind: input, shape index: {}]   ;;  %s3805_s0 = inlined_call_operand.vmem [shape: bf16[512,128], index: 0, kind: input, shape index: {}]   ;;  %s3806_s4 = inlined_call_operand.vmem [shape: bf16[128,128], index: 4, kind: input, shape index: {}]   ;;  %s3807_s3 = inlined_call_operand.vmem [shape: bf16[8,128], index: 3, kind: input, shape index: {}]   ;;  %s3808_s6 = inlined_call_operand.vmem [shape: bf16[128,128], index: 6, kind: input, shape index: {}]   ;;  %s3809_s2 = inlined_call_operand.vmem [shape: f32[1,128], index: 2, kind: input, shape index: {}]   ;;  %s3810_s8 = inlined_call_operand.vmem [shape: bf16[256,256], index: 8, kind: input, shape index: {}]   ;;  %s3811_s5 = inlined_call_operand.vmem [shape: f32[1,128], index: 5, kind: input, shape index: {}]   ;;  %s3812_s12 = inlined_call_operand.vmem [shape: f32[8,384], index: 12, kind: output, shape index: {}]   ;;  %s3813_s7 = inlined_call_operand.vmem [shape: f32[1,128], index: 7, kind: input, shape index: {}]   ;;  %s3814_s10 = inlined_call_operand.vmem [shape: bf16[256,128], index: 10, kind: input, shape index: {}]   ;;  %s3815_s9 = inlined_call_operand.vmem [shape: f32[1,256], index: 9, kind: input, shape index: {}]   ;;  %s3816_s11 = inlined_call_operand.vmem [shape: f32[1,128], index: 11, kind: input, shape index: {}]  }
   0x1   :  { %v2438_v0 = vld [vmem:[%s3804_s1] sm:$0xff]   ;;  %v2439_v1 = vld [vmem:[%s3804_s1 + $0x8] sm:$0xff]   ;;  %v2440_v2 = vld [vmem:[%s3804_s1 + $0x10] sm:$0xff]  }
   0x2   :  { %2268 = vmatprep.subr.bf16.mxu0 %v2438_v0  ;;  %2300 = vmatprep.subr.bf16.mxu1 %v2438_v0  ;;  %v2910_v3 = vld [vmem:[%s3804_s1 + $0x18] sm:$0xff]   ;;  %v2446_v4 = vld [vmem:[%s3805_s0] sm:$0xff]   ;;  %v2932_v7 = vld [vmem:[%s3804_s1 + $0x28] sm:$0xff]  }
   0x3   :  { %2269 = vmatpush3.bf16.msra.mxu0 %v2438_v0  ;;  %2301 = vmatpush3.bf16.msra.mxu1 %v2438_v0  ;;  %v2447_v5 = vld [vmem:[%s3805_s0 + $0x40] sm:$0xff]   ;;  %v2941_v8 = vld [vmem:[%s3804_s1 + $0x30] sm:$0xff]   ;;  %v2950_v9 = vld [vmem:[%s3804_s1 + $0x38] sm:$0xff]  }
   0x4   :  { %2270 = vmatprep.subr.bf16.mxu0 %v2439_v1  ;;  %2302 = vmatprep.subr.bf16.mxu1 %v2439_v1  ;;  %v2923_v6 = vld [vmem:[%s3804_s1 + $0x20] sm:$0xff]   ;;  %v2448_v10 = vld [vmem:[%s3805_s0 + $0x8] sm:$0xff]   ;;  %v2450_v12 = vld [vmem:[%s3805_s0 + $0x10] sm:$0xff]  }
   0x5   :  { %2284 = vmatprep.mubr.bf16.mxu0 %v2446_v4  ;;  %2316 = vmatprep.mubr.bf16.mxu1 %v2447_v5  ;;  %v2449_v11 = vld [vmem:[%s3805_s0 + $0x48] sm:$0xff]   ;;  %v2451_v13 = vld [vmem:[%s3805_s0 + $0x50] sm:$0xff]   ;;  %v2452_v14 = vld [vmem:[%s3805_s0 + $0x18] sm:$0xff]  }
   0x6   :  { %v2453_v15 = vld [vmem:[%s3805_s0 + $0x58] sm:$0xff]   ;;  %v2454_v16 = vld [vmem:[%s3805_s0 + $0x20] sm:$0xff]   ;;  %v2456_v18 = vld [vmem:[%s3805_s0 + $0x28] sm:$0xff]  }
   0x7   :  { %2271 = vmatpush3.bf16.msra.mxu0 %v2439_v1  ;;  %2303 = vmatpush3.bf16.msra.mxu1 %v2439_v1  ;;  %v2455_v17 = vld [vmem:[%s3805_s0 + $0x60] sm:$0xff]   ;;  %v2457_v19 = vld [vmem:[%s3805_s0 + $0x68] sm:$0xff]   ;;  %v2458_v20 = vld [vmem:[%s3805_s0 + $0x30] sm:$0xff]  }
   0x8   :  { %2272 = vmatprep.subr.bf16.mxu0 %v2440_v2  ;;  %2304 = vmatprep.subr.bf16.mxu1 %v2440_v2  ;;  %v2459_v21 = vld [vmem:[%s3805_s0 + $0x70] sm:$0xff]   ;;  %v2460_v22 = vld [vmem:[%s3805_s0 + $0x38] sm:$0xff]   ;;  %v2462_v24 = vld [vmem:[%s3805_s0 + $0x80] sm:$0xff]  }
   0x9   :  { %v2461_v23 = vld [vmem:[%s3805_s0 + $0x78] sm:$0xff]   ;;  %v2463_v25 = vld [vmem:[%s3805_s0 + $0xc0] sm:$0xff]   ;;  %v2464_v26 = vld [vmem:[%s3805_s0 + $0x88] sm:$0xff]  }
   0xa   :  { %v2465_v27 = vld [vmem:[%s3805_s0 + $0xc8] sm:$0xff]   ;;  %v2466_v28 = vld [vmem:[%s3806_s4] sm:$0xff]   ;;  %v2468_v29 = vld [vmem:[%s3805_s0 + $0x90] sm:$0xff]  }
   0xb   :  { %2273 = vmatpush3.bf16.msra.mxu0 %v2440_v2  ;;  %2305 = vmatpush3.bf16.msra.mxu1 %v2440_v2  ;;  %v2469_v31 = vld [vmem:[%s3805_s0 + $0xd0] sm:$0xff]   ;;  %v2467_v32 = vld [vmem:[%s3806_s4 + $0x8] sm:$0xff]   ;;  %v2470_v33 = vld [vmem:[%s3805_s0 + $0x98] sm:$0xff]  }
   0xc   :  { %2274 = vmatprep.subr.bf16.mxu0 %v2910_v3  ;;  %2306 = vmatprep.subr.bf16.mxu1 %v2910_v3  ;;  %v2471_v34 = vld [vmem:[%s3805_s0 + $0xd8] sm:$0xff]   ;;  %v2472_v35 = vld [vmem:[%s3806_s4 + $0x10] sm:$0xff]   ;;  %v2474_v36 = vld [vmem:[%s3805_s0 + $0xa0] sm:$0xff]  }
   0xd   :  { %v2475_v37 = vld [vmem:[%s3805_s0 + $0xe0] sm:$0xff]   ;;  %v2473_v38 = vld [vmem:[%s3806_s4 + $0x18] sm:$0xff]   ;;  %v2476_v39 = vld [vmem:[%s3805_s0 + $0xa8] sm:$0xff]  }
   0xe   :  { %v2477_v40 = vld [vmem:[%s3805_s0 + $0xe8] sm:$0xff]   ;;  %v2478_v41 = vld [vmem:[%s3806_s4 + $0x20] sm:$0xff]   ;;  %v2480_v42 = vld [vmem:[%s3805_s0 + $0xb0] sm:$0xff]  }
   0xf   :  { %2275 = vmatpush3.bf16.msra.mxu0 %v2910_v3  ;;  %2307 = vmatpush3.bf16.msra.mxu1 %v2910_v3  ;;  %v2481_v43 = vld [vmem:[%s3805_s0 + $0xf0] sm:$0xff]   ;;  %v2479_v44 = vld [vmem:[%s3806_s4 + $0x28] sm:$0xff]   ;;  %v2482_v45 = vld [vmem:[%s3805_s0 + $0xb8] sm:$0xff]  }
  0x10   :  { %2276 = vmatprep.subr.bf16.mxu0 %v2923_v6  ;;  %2308 = vmatprep.subr.bf16.mxu1 %v2923_v6  ;;  %v2483_v46 = vld [vmem:[%s3805_s0 + $0xf8] sm:$0xff]   ;;  %v2484_v47 = vld [vmem:[%s3806_s4 + $0x30] sm:$0xff]   ;;  %v1305_v49 = vld [vmem:[%s3807_s3] sm:$0xf] }
  0x11   :  { %v2485_v48 = vld [vmem:[%s3806_s4 + $0x38] sm:$0xff]   ;;  %v2486_v50 = vld [vmem:[%s3808_s6] sm:$0xff]   ;;  %v2487_v51 = vld [vmem:[%s3808_s6 + $0x8] sm:$0xff]  }
  0x12   :  { %v3116_v52 = vld [vmem:[%s3809_s2] ss:$0 sm:$0xff]  ;;  %v2488_v55 = vld [vmem:[%s3808_s6 + $0x10] sm:$0xff]  }
  0x13   :  { %2277 = vmatpush3.bf16.msra.mxu0 %v2923_v6  ;;  %2309 = vmatpush3.bf16.msra.mxu1 %v2923_v6 }
  0x14   :  { %2278 = vmatprep.subr.bf16.mxu0 %v2932_v7  ;;  %2310 = vmatprep.subr.bf16.mxu1 %v2932_v7 }
  0x17   :  { %2279 = vmatpush3.bf16.msra.mxu0 %v2932_v7  ;;  %2311 = vmatpush3.bf16.msra.mxu1 %v2932_v7 }
  0x18   :  { %2280 = vmatprep.subr.bf16.mxu0 %v2941_v8  ;;  %2312 = vmatprep.subr.bf16.mxu1 %v2941_v8 }
  0x1b   :  { %2281 = vmatpush3.bf16.msra.mxu0 %v2941_v8  ;;  %2313 = vmatpush3.bf16.msra.mxu1 %v2941_v8 }
  0x1c   :  { %2282 = vmatprep.subr.bf16.mxu0 %v2950_v9  ;;  %2314 = vmatprep.subr.bf16.mxu1 %v2950_v9 }
  0x1f   :  { %2283 = vmatpush3.bf16.msra.mxu0 %v2950_v9  ;;  %2315 = vmatpush3.bf16.msra.mxu1 %v2950_v9 }
  0x20   :  { %2332 = vmatprep.subr.bf16.mxu0 %v2438_v0  ;;  %2364 = vmatprep.subr.bf16.mxu1 %v2438_v0 }
  0x22   :  { %2285 = vmatmul.mubr.bf16.vlgmr.msra.gmra.mrb[0].mxu0 %v2448_v10  ;;  %2317 = vmatmul.mubr.bf16.vlgmr.msra.gmra.mrb[0].mxu1 %v2449_v11  ;;  %v2489_v10 = vld [vmem:[%s3808_s6 + $0x18] sm:$0xff]  }
  0x23   :  { %2333 = vmatpush3.bf16.msra.mxu0 %v2438_v0  ;;  %2365 = vmatpush3.bf16.msra.mxu1 %v2438_v0 }
  0x24   :  { %2334 = vmatprep.subr.bf16.mxu0 %v2439_v1  ;;  %2366 = vmatprep.subr.bf16.mxu1 %v2439_v1 }
  0x25   :  { %2288 = vmatprep.mubr.bf16.mxu0 %v2450_v12  ;;  %2320 = vmatprep.mubr.bf16.mxu1 %v2451_v13 }
  0x27   :  { %2335 = vmatpush3.bf16.msra.mxu0 %v2439_v1  ;;  %2367 = vmatpush3.bf16.msra.mxu1 %v2439_v1 }
  0x28   :  { %2336 = vmatprep.subr.bf16.mxu0 %v2440_v2  ;;  %2368 = vmatprep.subr.bf16.mxu1 %v2440_v2 }
  0x2a   :  { %2289 = vmatmul.mubr.bf16.gmra.mrb[4].mxu0 %v2452_v14  ;;  %2321 = vmatmul.mubr.bf16.gmra.mrb[4].mxu1 %v2453_v15 }
  0x2b   :  { %2337 = vmatpush3.bf16.msra.mxu0 %v2440_v2  ;;  %2369 = vmatpush3.bf16.msra.mxu1 %v2440_v2 }
  0x2c   :  { %2338 = vmatprep.subr.bf16.mxu0 %v2910_v3  ;;  %2370 = vmatprep.subr.bf16.mxu1 %v2910_v3 }
  0x2d   :  { %2292 = vmatprep.mubr.bf16.mxu0 %v2454_v16  ;;  %2324 = vmatprep.mubr.bf16.mxu1 %v2455_v17  ;;  %v2490_v17 = vld [vmem:[%s3808_s6 + $0x20] sm:$0xff]  }
  0x2f   :  { %2339 = vmatpush3.bf16.msra.mxu0 %v2910_v3  ;;  %2371 = vmatpush3.bf16.msra.mxu1 %v2910_v3 }
  0x30   :  { %2340 = vmatprep.subr.bf16.mxu0 %v2923_v6  ;;  %2372 = vmatprep.subr.bf16.mxu1 %v2923_v6 }
  0x32   :  { %2293 = vmatmul.mubr.bf16.gmra.mrb[8].mxu0 %v2456_v18  ;;  %2325 = vmatmul.mubr.bf16.gmra.mrb[8].mxu1 %v2457_v19 }
  0x33   :  { %2341 = vmatpush3.bf16.msra.mxu0 %v2923_v6  ;;  %2373 = vmatpush3.bf16.msra.mxu1 %v2923_v6 }
  0x34   :  { %2342 = vmatprep.subr.bf16.mxu0 %v2932_v7  ;;  %2374 = vmatprep.subr.bf16.mxu1 %v2932_v7 }
  0x35   :  { %2296 = vmatprep.mubr.bf16.mxu0 %v2458_v20  ;;  %2328 = vmatprep.mubr.bf16.mxu1 %v2459_v21 }
  0x37   :  { %2343 = vmatpush3.bf16.msra.mxu0 %v2932_v7  ;;  %2375 = vmatpush3.bf16.msra.mxu1 %v2932_v7 }
  0x38   :  { %2344 = vmatprep.subr.bf16.mxu0 %v2941_v8  ;;  %2376 = vmatprep.subr.bf16.mxu1 %v2941_v8 }
  0x3a   :  { %2297 = vmatmul.mubr.bf16.gmra.mrb[12].mxu0 %v2460_v22  ;;  %2329 = vmatmul.mubr.bf16.gmra.mrb[12].mxu1 %v2461_v23 }
  0x3b   :  { %2345 = vmatpush3.bf16.msra.mxu0 %v2941_v8  ;;  %2377 = vmatpush3.bf16.msra.mxu1 %v2941_v8 }
  0x3c   :  { %2346 = vmatprep.subr.bf16.mxu0 %v2950_v9  ;;  %2378 = vmatprep.subr.bf16.mxu1 %v2950_v9 }
  0x3d   :  { %2348 = vmatprep.mubr.bf16.mxu0 %v2462_v24  ;;  %2380 = vmatprep.mubr.bf16.mxu1 %v2463_v25 }
  0x3f   :  { %2347 = vmatpush3.bf16.msra.mxu0 %v2950_v9  ;;  %2379 = vmatpush3.bf16.msra.mxu1 %v2950_v9 }
  0x40   :  { %2396 = vmatprep.subr.bf16.mxu0 %v2831_v30  ;;  %2416 = vmatprep.subr.bf16.mxu1 %v2831_v30 }
  0x42   :  { %2349 = vmatmul.mubr.bf16.vlgmr.msra.gmra.mrb[16].mxu0 %v2464_v26  ;;  %2381 = vmatmul.mubr.bf16.vlgmr.msra.gmra.mrb[16].mxu1 %v2465_v27 }
  0x43   :  { %2397 = vmatpush3.bf16.msra.mxu0 %v2466_v28  ;;  %2352 = vmatprep.mubr.bf16.mxu0 %v2468_v29 }
  0x44   :  { %2398 = vmatprep.subr.bf16.mxu0 %v2831_v30  ;;  %2384 = vmatprep.mubr.bf16.mxu1 %v2469_v31 }
  0x45   :  { %2417 = vmatpush3.bf16.msra.mxu1 %v2486_v50 }
  0x46   :  { %2418 = vmatprep.subr.bf16.mxu1 %v2831_v30 }
  0x47   :  { %2399 = vmatpush3.bf16.msra.mxu0 %v2467_v32 }
  0x48   :  { %2400 = vmatprep.subr.bf16.mxu0 %v2831_v30 }
  0x49   :  { %2419 = vmatpush3.bf16.msra.mxu1 %v2487_v51 }
  0x4a   :  { %2353 = vmatmul.mubr.bf16.gmra.mrb[20].mxu0 %v2470_v33  ;;  %2385 = vmatmul.mubr.bf16.gmra.mrb[20].mxu1 %v2471_v34  ;;  %v2491_v34 = vld [vmem:[%s3808_s6 + $0x28] sm:$0xff]  }
  0x4b   :  { %2401 = vmatpush3.bf16.msra.mxu0 %v2472_v35  ;;  %2356 = vmatprep.mubr.bf16.mxu0 %v2474_v36 }
  0x4c   :  { %2402 = vmatprep.subr.bf16.mxu0 %v2831_v30  ;;  %2388 = vmatprep.mubr.bf16.mxu1 %v2475_v37 }
  0x4d   :  { %2420 = vmatprep.subr.bf16.mxu1 %v2831_v30 }
  0x4e   :  { %2421 = vmatpush3.bf16.msra.mxu1 %v2488_v55 }
  0x4f   :  { %2403 = vmatpush3.bf16.msra.mxu0 %v2473_v38  ;;  %2422 = vmatprep.subr.bf16.mxu1 %v2831_v30 }
  0x50   :  { %2404 = vmatprep.subr.bf16.mxu0 %v2831_v30 }
  0x52   :  { %2357 = vmatmul.mubr.bf16.gmra.mrb[24].mxu0 %v2476_v39  ;;  %2389 = vmatmul.mubr.bf16.gmra.mrb[24].mxu1 %v2477_v40 }
  0x53   :  { %2405 = vmatpush3.bf16.msra.mxu0 %v2478_v41  ;;  %2360 = vmatprep.mubr.bf16.mxu0 %v2480_v42  ;;  %v2492_v41 = vld [vmem:[%s3808_s6 + $0x30] sm:$0xff]  }
  0x54   :  { %2406 = vmatprep.subr.bf16.mxu0 %v2831_v30  ;;  %2392 = vmatprep.mubr.bf16.mxu1 %v2481_v43 }
  0x55   :  { %2423 = vmatpush3.bf16.msra.mxu1 %v2489_v10 }
  0x56   :  { %2424 = vmatprep.subr.bf16.mxu1 %v2831_v30 }
  0x57   :  { %2407 = vmatpush3.bf16.msra.mxu0 %v2479_v44 }
  0x58   :  { %2408 = vmatprep.subr.bf16.mxu0 %v2831_v30 }
  0x59   :  { %2425 = vmatpush3.bf16.msra.mxu1 %v2490_v17 }
  0x5a   :  { %2361 = vmatmul.mubr.bf16.gmra.mrb[28].mxu0 %v2482_v45  ;;  %2393 = vmatmul.mubr.bf16.gmra.mrb[28].mxu1 %v2483_v46 }
  0x5b   :  { %2409 = vmatpush3.bf16.msra.mxu0 %v2484_v47  ;;  %2412 = vmatprep.mubr.msk.bf16.mxu0 %vm2832_vm0, %v2831_v30 }
  0x5c   :  { %2410 = vmatprep.subr.bf16.mxu0 %v2831_v30  ;;  %2432 = vmatprep.mubr.msk.bf16.mxu1 %vm2832_vm0, %v2831_v30 }
  0x5d   :  { %2426 = vmatprep.subr.bf16.mxu1 %v2831_v30 }
  0x5e   :  { %2427 = vmatpush3.bf16.msra.mxu1 %v2491_v34 }
  0x5f   :  { %2411 = vmatpush3.bf16.msra.mxu0 %v2485_v48  ;;  %2428 = vmatprep.subr.bf16.mxu1 %v2831_v30 }
  0x62   :  { %2413 = vmatmul.mubr.bf16.vlgmr.msra.gmra.mrb[32].mxu0 %v1305_v49  ;;  %2429 = vmatpush3.bf16.msra.mxu1 %v2492_v41 }
  0x63   :  { %2430 = vmatprep.subr.bf16.mxu1 %v2831_v30 }
  0xf5   :  { %v2286_v53 = vpop.f32.mrb[0].mxu0  ;;  %v2318_v54 = vpop.f32.mrb[0].mxu1 }
  0xf6   :  { %v3123_v56 = vadd.f32 %v2286_v53, %v3116_v52  ;;  %v3126_v57 = vadd.f32 %v2318_v54, %v3116_v52  ;;  %v213_v58 = vpop.f32.mrb[1].mxu0  ;;  %v508_v59 = vpop.f32.mrb[1].mxu1 }
  0xf7   :  { %v3129_v60 = vadd.f32 %v3116_v52, %v213_v58  ;;  %v3132_v61 = vadd.f32 %v3116_v52, %v508_v59  ;;  %v2287_v62 = vpop.f32.mrb[2].mxu0  ;;  %v2319_v63 = vpop.f32.mrb[2].mxu1 }
  0xf8   :  { %v2007_v0 = vmul.f32 -1.442695, %v3123_v56  ;;  %v2031_v1 = vmul.f32 -1.442695, %v3126_v57  ;;  %v3137_v2 = vadd.f32 %v2287_v62, %v3116_v52  ;;  %v3140_v3 = vadd.f32 %v2319_v63, %v3116_v52  ;;  %v216_v4 = vpop.f32.mrb[3].mxu0  ;;  %v511_v5 = vpop.f32.mrb[3].mxu1 }
  0xf9   :  { %v2005_v6 = vmul.f32 -1.442695, %v3129_v60  ;;  %v2029_v7 = vmul.f32 -1.442695, %v3132_v61  ;;  %v3145_v8 = vadd.f32 %v3116_v52, %v216_v4  ;;  %v3148_v9 = vadd.f32 %v3116_v52, %v511_v5  ;;  %v2493_v63 = vld [vmem:[%s3808_s6 + $0x38] sm:$0xff]  }
  0xfa   :  { %2558 = vpow2.f32 %v2007_v0  ;;  %v2008_v11 = vmul.f32 -1.442695, %v3137_v2  ;;  %v2032_v12 = vmul.f32 -1.442695, %v3140_v3  ;;  %2431 = vmatpush3.bf16.msra.mxu1 %v2493_v63 }
  0xfb   :  { %2560 = vpow2.f32 %v2031_v1  ;;  %v2006_v13 = vmul.f32 -1.442695, %v3145_v8  ;;  %v2030_v14 = vmul.f32 -1.442695, %v3148_v9 }
  0xfc   :  { %2562 = vpow2.f32 %v2005_v6 }
  0xfd   :  { %2564 = vpow2.f32 %v2029_v7  ;;  %v2290_v15 = vpop.f32.mrb[4].mxu0  ;;  %v2322_v16 = vpop.f32.mrb[4].mxu1 }
  0xfe   :  { %2566 = vpow2.f32 %v2008_v11  ;;  %v3163_v18 = vadd.f32 %v2290_v15, %v3116_v52  ;;  %v3166_v19 = vadd.f32 %v2322_v16, %v3116_v52  ;;  %v229_v20 = vpop.f32.mrb[5].mxu0  ;;  %v524_v21 = vpop.f32.mrb[5].mxu1 }
  0xff   :  { %2568 = vpow2.f32 %v2032_v12  ;;  %v3169_v22 = vadd.f32 %v3116_v52, %v229_v20  ;;  %v3172_v23 = vadd.f32 %v3116_v52, %v524_v21  ;;  %v2291_v24 = vpop.f32.mrb[6].mxu0  ;;  %v2323_v25 = vpop.f32.mrb[6].mxu1 }
 0x100   :  { %2570 = vpow2.f32 %v2006_v13  ;;  %v2011_v26 = vmul.f32 -1.442695, %v3163_v18  ;;  %v2035_v27 = vmul.f32 -1.442695, %v3166_v19  ;;  %v3177_v28 = vadd.f32 %v2291_v24, %v3116_v52  ;;  %v232_v29 = vpop.f32.mrb[7].mxu0  ;;  %v527_v31 = vpop.f32.mrb[7].mxu1 }
 0x101   :  { %2572 = vpow2.f32 %v2030_v14  ;;  %v2009_v32 = vmul.f32 -1.442695, %v3169_v22  ;;  %v2033_v33 = vmul.f32 -1.442695, %v3172_v23  ;;  %v3195_v6 = vadd.f32 %v2323_v25, %v3116_v52 }
 0x102   :  { %2574 = vpow2.f32 %v2011_v26  ;;  %v2012_v35 = vmul.f32 -1.442695, %v3177_v28  ;;  %v3198_v10 = vadd.f32 %v3116_v52, %v232_v29  ;;  %v3201_v14 = vadd.f32 %v3116_v52, %v527_v31 }
 0x103   :  { %2576 = vpow2.f32 %v2035_v27  ;;  %v2036_v29 = vmul.f32 -1.442695, %v3195_v6 }
 0x104   :  { %v2559_v36 = vpop.eup %2558  ;;  %2578 = vpow2.f32 %v2009_v32  ;;  %v2034_v41 = vmul.f32 -1.442695, %v3201_v14 }
 0x105   :  { %v2561_v37 = vpop.eup %2560  ;;  %v326_v38 = vadd.f32 1.0, %v2559_v36  ;;  %2580 = vpow2.f32 %v2033_v33  ;;  %v2294_v39 = vpop.f32.mrb[8].mxu0  ;;  %v2010_v36 = vmul.f32 -1.442695, %v3198_v10 }
 0x106   :  { %v2326_v40 = vpop.f32.mrb[8].mxu1  ;;  %v2563_v42 = vpop.eup %2562  ;;  %v621_v43 = vadd.f32 1.0, %v2561_v37  ;;  %2582 = vpow2.f32 %v2012_v35  ;;  %v3206_v21 = vadd.f32 %v2294_v39, %v3116_v52 }
 0x107   :  { %v245_v44 = vpop.f32.mrb[9].mxu0  ;;  %v540_v45 = vpop.f32.mrb[9].mxu1  ;;  %2584 = vrcp.f32 %v326_v38  ;;  %v324_v47 = vadd.f32 1.0, %v2563_v42  ;;  %v3214_v31 = vadd.f32 %v2326_v40, %v3116_v52 }
 0x108   :  { %v2565_v46 = vpop.eup %2564  ;;  %v2295_v48 = vpop.f32.mrb[10].mxu0  ;;  %2586 = vrcp.f32 %v621_v43  ;;  %v3222_v37 = vadd.f32 %v3116_v52, %v245_v44  ;;  %v3228_v40 = vadd.f32 %v3116_v52, %v540_v45 }
 0x109   :  { %v2327_v49 = vpop.f32.mrb[10].mxu1  ;;  %v2567_v50 = vpop.eup %2566  ;;  %v619_v51 = vadd.f32 1.0, %v2565_v46  ;;  %2588 = vrcp.f32 %v324_v47  ;;  %v3231_v42 = vadd.f32 %v2295_v48, %v3116_v52  ;;  %v2015_v46 = vmul.f32 -1.442695, %v3206_v21 }
 0x10a   :  { %v248_v53 = vpop.f32.mrb[11].mxu0  ;;  %v2569_v54 = vpop.eup %2568  ;;  %v327_v55 = vadd.f32 1.0, %v2567_v50  ;;  %v3235_v47 = vadd.f32 %v2327_v49, %v3116_v52  ;;  %v2039_v50 = vmul.f32 -1.442695, %v3214_v31  ;;  %v2013_v45 = vmul.f32 -1.442695, %v3222_v37 }
 0x10b   :  { %v543_v58 = vpop.f32.mrb[11].mxu1  ;;  %v2571_v59 = vpop.eup %2570  ;;  %2590 = vrcp.f32 %v619_v51  ;;  %v622_v62 = vadd.f32 1.0, %v2569_v54  ;;  %v3239_v51 = vadd.f32 %v3116_v52, %v248_v53  ;;  %v2016_v63 = vmul.f32 -1.442695, %v3231_v42 }
 0x10c   :  { %v2573_v0 = vpop.eup %2572  ;;  %2592 = vrcp.f32 %v327_v55  ;;  %v325_v1 = vadd.f32 1.0, %v2571_v59  ;;  %v3243_v48 = vadd.f32 %v3116_v52, %v543_v58 }
 0x10d   :  { %v2575_v4 = vpop.eup %2574  ;;  %2594 = vrcp.f32 %v622_v62  ;;  %v620_v5 = vadd.f32 1.0, %v2573_v0  ;;  %v2298_v11 = vpop.f32.mrb[12].mxu0  ;;  %v2037_v62 = vmul.f32 -1.442695, %v3228_v40 }
 0x10e   :  { %v2577_v7 = vpop.eup %2576  ;;  %2596 = vrcp.f32 %v325_v1  ;;  %v330_v30 = vadd.f32 1.0, %v2575_v4  ;;  %v2330_v15 = vpop.f32.mrb[12].mxu1  ;;  %v3252_v53 = vadd.f32 %v2298_v11, %v3116_v52 }
 0x10f   :  { %v2579_v12 = vpop.eup %2578  ;;  %2598 = vrcp.f32 %v620_v5  ;;  %v625_v13 = vadd.f32 1.0, %v2577_v7  ;;  %v3203_v16 = vpop.f32.mrb[13].mxu0  ;;  %v2040_v5 = vmul.f32 -1.442695, %v3235_v47  ;;  %v3261_v7 = vadd.f32 %v2330_v15, %v3116_v52 }
 0x110   :  { %v2581_v17 = vpop.eup %2580  ;;  %2600 = vrcp.f32 %v330_v30  ;;  %v328_v20 = vadd.f32 1.0, %v2579_v12  ;;  %v3208_v24 = vpop.f32.mrb[13].mxu1  ;;  %3821 = vst [vmem:[#allocation2_spill] sm:$0xff] %v3252_v53 }
 0x111   :  { %v3210_v25 = vpop.f32.mrb[14].mxu0  ;;  %v2583_v26 = vpop.eup %2582  ;;  %2602 = vrcp.f32 %v625_v13  ;;  %v623_v27 = vadd.f32 1.0, %v2581_v17 }
 0x112   :  { %v3216_v32 = vpop.f32.mrb[14].mxu1  ;;  %v3218_v33 = vpop.f32.mrb[15].mxu0  ;;  %2604 = vrcp.f32 %v328_v20  ;;  %v331_v35 = vadd.f32 1.0, %v2583_v26  ;;  %v2014_v20 = vmul.f32 -1.442695, %v3239_v51 }
 0x113   :  { %v2585_v34 = vpop.eup %2584  ;;  %v3224_v38 = vpop.f32.mrb[15].mxu1  ;;  %2606 = vrcp.f32 %v623_v27 }
 0x114   :  { %v2587_v39 = vpop.eup %2586  ;;  %2608 = vrcp.f32 %v331_v35  ;;  %v2038_v35 = vmul.f32 -1.442695, %v3243_v48 }
 0x115   :  { %v2589_v43 = vpop.eup %2588  ;;  %2610 = vpow2.f32 %v2036_v29  ;;  %v3245_v55 = vpop.f32.mrb[16].mxu0  ;;  %v669_v15 = vmul.f32 %v2587_v39, %v3126_v57  ;;  %v2496_v57 = vld [vmem:[%s3810_s8 + $0x4] ss:$8 sps:$4 sm:$0xff]  }
 0x116   :  { %v2591_v44 = vpop.eup %2590  ;;  %2612 = vpow2.f32 %v2010_v36  ;;  %v3247_v59 = vpop.f32.mrb[16].mxu1  ;;  %v372_v11 = vmul.f32 %v2589_v43, %v3129_v60  ;;  %v2494_v60 = vld [vmem:[%s3810_s8] ss:$8 sps:$4 sm:$0xff]   ;;  %v374_v36 = vmul.f32 %v2585_v34, %v3123_v56  ;;  %v2019_v43 = vmul.f32 -1.442695, %v3252_v53  ;;  %1749 = vmatprep.subr.bf16.mxu0 %v2496_v57 }
 0x117   :  { %v2593_v54 = vpop.eup %2592  ;;  %2614 = vpow2.f32 %v2034_v41  ;;  %v3254_v0 = vpop.f32.mrb[17].mxu0  ;;  %v667_v58 = vmul.f32 %v2591_v44, %v3132_v61  ;;  %v2043_v44 = vmul.f32 -1.442695, %v3261_v7  ;;  %1750 = vmatpush1.bf16.msra.mxu0 %v2494_v60 }
 0x118   :  { %v2595_v49 = vpop.eup %2594  ;;  %v3256_v1 = vpop.f32.mrb[17].mxu1  ;;  %2616 = vpow2.f32 %v2015_v46  ;;  %v375_v34 = vmul.f32 %v2593_v54, %v3137_v2  ;;  %v2497_v2 = vld [vmem:[%s3810_s8 + $0x10] ss:$8 sps:$4 sm:$0xff]  }
 0x119   :  { %v2597_v4 = vpop.eup %2596  ;;  %v3263_v30 = vpop.f32.mrb[18].mxu0  ;;  %2618 = vpow2.f32 %v2039_v50  ;;  %v670_v39 = vmul.f32 %v2595_v49, %v3140_v3  ;;  %v2499_v50 = vld [vmem:[%s3810_s8 + $0x14] ss:$8 sps:$4 sm:$0xff]  }
 0x11a   :  { %v3265_v12 = vpop.f32.mrb[18].mxu1  ;;  %v2599_v13 = vpop.eup %2598  ;;  %v373_v17 = vmul.f32 %v2597_v4, %v3145_v8  ;;  %2620 = vpow2.f32 %v2013_v45  ;;  %1751 = vmatprep.subr.bf16.mxu0 %v2499_v50  ;;  %v2500_v50 = vld [vmem:[%s3810_s8 + $0x20] ss:$8 sps:$4 sm:$0xff]  }
 0x11b   :  { %v3270_v26 = vpop.f32.mrb[19].mxu0  ;;  %v3272_v61 = vpop.f32.mrb[19].mxu1  ;;  %v668_v29 = vmul.f32 %v2599_v13, %v3148_v9  ;;  %2622 = vpow2.f32 %v2037_v62  ;;  %1752 = vmatpush1.bf16.msra.mxu0 %v2497_v2 }
 0x11c   :  { %v3274_v27 = vpop.eup %2600  ;;  %v388_v41 = vadd.f32 %v373_v17, %v372_v11  ;;  %2624 = vpow2.f32 %v2016_v63 }
 0x11d   :  { %v3282_v8 = vpop.eup %2602  ;;  %v683_v46 = vadd.f32 %v668_v29, %v667_v58  ;;  %2626 = vpow2.f32 %v2040_v5  ;;  %v3299_v49 = vpop.f32.mrb[20].mxu0 }
 0x11e   :  { %v2605_v9 = vpop.eup %2604  ;;  %v389_v45 = vadd.f32 %v388_v41, %v374_v36  ;;  %2628 = vpow2.f32 %v2014_v20  ;;  %v3301_v63 = vpop.f32.mrb[20].mxu1 }
 0x11f   :  { %v2607_v56 = vpop.eup %2606  ;;  %v376_v62 = vmul.f32 %v2605_v9, %v3169_v22  ;;  %v684_v13 = vadd.f32 %v683_v46, %v669_v15  ;;  %2630 = vpow2.f32 %v2038_v35  ;;  %v3306_v22 = vpop.f32.mrb[21].mxu0 }
 0x120   :  { %v3296_v4 = vpop.eup %2608  ;;  %v671_v3 = vmul.f32 %v2607_v56, %v3172_v23  ;;  %v390_v58 = vadd.f32 %v389_v45, %v375_v34  ;;  %v3308_v5 = vpop.f32.mrb[21].mxu1  ;;  %v2502_v23 = vld [vmem:[%s3810_s8 + $0x24] ss:$8 sps:$4 sm:$0xff]   ;;  %2632 = vpow2.f32 %v2019_v43  ;;  %v3327_v43 = vadd.f32 %v3116_v52, %v3203_v16  ;;  %v2505_v34 = vld [vmem:[%s3810_s8 + $0x34] ss:$8 sps:$4 sm:$0xff]  }
 0x121   :  { %v2611_v54 = vpop.eup %2610  ;;  %v685_v17 = vadd.f32 %v684_v13, %v670_v39  ;;  %v3313_v15 = vpop.f32.mrb[22].mxu0  ;;  %2634 = vpow2.f32 %v2043_v44  ;;  %1753 = vmatprep.subr.bf16.mxu0 %v2502_v23  ;;  %v3344_v23 = vadd.f32 %v3210_v25, %v3116_v52  ;;  %v2508_v25 = vld [vmem:[%s3810_s8 + $0x44] ss:$8 sps:$4 sm:$0xff]  }
 0x122   :  { %v2613_v11 = vpop.eup %2612  ;;  %v626_v20 = vadd.f32 1.0, %v2611_v54  ;;  %v3315_v29 = vpop.f32.mrb[22].mxu1  ;;  %v3317_v36 = vadd.f32 %v390_v58, %v376_v62  ;;  %v3340_v58 = vmul.f32 -1.442695, %v3327_v43  ;;  %1754 = vmatpush1.bf16.msra.mxu0 %v2500_v50 }
 0x123   :  { %v2615_v60 = vpop.eup %2614  ;;  %v329_v35 = vadd.f32 1.0, %v2613_v11  ;;  %v3319_v41 = vpop.f32.mrb[23].mxu0  ;;  %v3323_v46 = vadd.f32 %v685_v17, %v671_v3  ;;  %v3337_v3 = vadd.f32 %v3116_v52, %v3208_v24  ;;  %3822 = vst [vmem:[#allocation3_spill] sm:$0xff] %v3344_v23  ;;  %v2503_v17 = vld [vmem:[%s3810_s8 + $0x30] ss:$8 sps:$4 sm:$0xff]   ;;  %1755 = vmatprep.subr.bf16.mxu0 %v2505_v34 }
 0x124   :  { %v3321_v57 = vpop.f32.mrb[23].mxu1  ;;  %v2617_v9 = vpop.eup %2616  ;;  %2636 = vrcp.f32 %v626_v20  ;;  %v624_v39 = vadd.f32 1.0, %v2615_v60  ;;  %v3353_v60 = vadd.f32 %v3216_v32, %v3116_v52  ;;  %v3368_v32 = vadd.f32 %v3116_v52, %v3224_v38 }
 0x125   :  { %v2619_v56 = vpop.eup %2618  ;;  %2638 = vrcp.f32 %v329_v35  ;;  %v334_v44 = vadd.f32 1.0, %v2617_v9  ;;  %v3346_v11 = vpop.f32.mrb[24].mxu0 }
 0x126   :  { %v2621_v45 = vpop.eup %2620  ;;  %2640 = vrcp.f32 %v624_v39  ;;  %v629_v62 = vadd.f32 1.0, %v2619_v56  ;;  %3823 = vst [vmem:[#allocation4_spill] sm:$0xff] %v3353_v60  ;;  %v3355_v35 = vpop.f32.mrb[24].mxu1  ;;  %v3364_v56 = vadd.f32 %v3116_v52, %v3218_v33  ;;  %1756 = vmatpush1.bf16.msra.mxu0 %v2503_v17  ;;  %v2042_v17 = vmul.f32 -1.442695, %v3368_v32 }
 0x127   :  { %v2623_v13 = vpop.eup %2622  ;;  %2642 = vrcp.f32 %v334_v44  ;;  %v332_v16 = vadd.f32 1.0, %v2621_v45  ;;  %v3357_v9 = vpop.f32.mrb[25].mxu0  ;;  %1757 = vmatprep.subr.bf16.mxu0 %v2508_v25 }
 0x128   :  { %v2625_v2 = vpop.eup %2624  ;;  %2644 = vrcp.f32 %v629_v62  ;;  %v627_v54 = vadd.f32 1.0, %v2623_v13  ;;  %v3370_v44 = vpop.f32.mrb[25].mxu1  ;;  %v2041_v13 = vmul.f32 -1.442695, %v3337_v3 }
 0x129   :  { %v2627_v20 = vpop.eup %2626  ;;  %2646 = vrcp.f32 %v332_v16  ;;  %v335_v24 = vadd.f32 1.0, %v2625_v2  ;;  %3824 = vst [vmem:[#allocation5_spill] sm:$0xff] %v3370_v44  ;;  %v3372_v45 = vpop.f32.mrb[26].mxu0  ;;  %v3377_v16 = vadd.f32 %v3245_v55, %v3116_v52  ;;  %v2506_v55 = vld [vmem:[%s3810_s8 + $0x40] ss:$8 sps:$4 sm:$0xff]  }
 0x12a   :  { %v2629_v39 = vpop.eup %2628  ;;  %2648 = vrcp.f32 %v627_v54  ;;  %v630_v50 = vadd.f32 1.0, %v2627_v20  ;;  %3825 = vst [vmem:[#allocation6_spill] sm:$0xff] %v3372_v45  ;;  %v3379_v2 = vpop.f32.mrb[26].mxu1  ;;  %v2020_v20 = vmul.f32 -1.442695, %v3344_v23  ;;  %v3386_v45 = vadd.f32 %v3247_v59, %v3116_v52  ;;  %1758 = vmatpush1.bf16.msra.mxu0 %v2506_v55 }
 0x12b   :  { %v2631_v34 = vpop.eup %2630  ;;  %2650 = vrcp.f32 %v335_v24  ;;  %v333_v62 = vadd.f32 1.0, %v2629_v39  ;;  %3826 = vst [vmem:[#allocation7_spill] sm:$0xff] %v3379_v2  ;;  %v3381_v33 = vpop.f32.mrb[27].mxu0  ;;  %v2055_v44 = vmul.f32 -1.442695, %v3377_v16 }
 0x12c   :  { %3827 = vst [vmem:[#allocation8_spill] sm:$0xff] %v3381_v33  ;;  %v2633_v54 = vpop.eup %2632  ;;  %2652 = vrcp.f32 %v630_v50  ;;  %v628_v38 = vadd.f32 1.0, %v2631_v34  ;;  %3828 = vst [vmem:[#allocation9_spill] sm:$0xff] %v3386_v45  ;;  %v3388_v24 = vpop.f32.mrb[27].mxu1  ;;  %v2044_v33 = vmul.f32 -1.442695, %v3353_v60 }
 0x12d   :  { %3829 = vst [vmem:[#allocation10_spill] sm:$0xff] %v3388_v24  ;;  %v2635_v39 = vpop.eup %2634  ;;  %2654 = vrcp.f32 %v333_v62  ;;  %v338_v2 = vadd.f32 1.0, %v2633_v54  ;;  %v2511_v50 = vld [vmem:[%s3810_s8 + $0x54] ss:$8 sps:$4 sm:$0xff]   ;;  %v2018_v24 = vmul.f32 -1.442695, %v3364_v56  ;;  %v3402_v62 = vadd.f32 %v3116_v52, %v3254_v0 }
 0x12e   :  { %v2637_v34 = vpop.eup %2636  ;;  %2656 = vrcp.f32 %v628_v38  ;;  %v633_v59 = vadd.f32 1.0, %v2635_v39  ;;  %v2079_v60 = vmul.f32 -1.442695, %v3386_v45  ;;  %v3408_v38 = vadd.f32 %v3116_v52, %v3256_v1  ;;  %v3410_v39 = vpop.f32.mrb[28].mxu0  ;;  %v2509_v0 = vld [vmem:[%s3810_s8 + $0x50] ss:$8 sps:$4 sm:$0xff]   ;;  %1759 = vmatprep.subr.bf16.mxu0 %v2511_v50 }
 0x12f   :  { %v2639_v23 = vpop.eup %2638  ;;  %2658 = vrcp.f32 %v338_v2  ;;  %3830 = vst [vmem:[#allocation11_spill] sm:$0xff] %v3410_v39  ;;  %v3412_v53 = vpop.f32.mrb[28].mxu1  ;;  %v2514_v55 = vld [vmem:[%s3810_s8 + $0x64] ss:$8 sps:$4 sm:$0xff]   ;;  %v674_v50 = vmul.f32 %v2637_v34, %v3195_v6  ;;  %1760 = vmatpush1.bf16.msra.mxu0 %v2509_v0 }
 0x130   :  { %v2641_v25 = vpop.eup %2640  ;;  %v377_v54 = vmul.f32 %v2639_v23, %v3198_v10  ;;  %2660 = vrcp.f32 %v633_v59  ;;  %3831 = vst [vmem:[#allocation12_spill] sm:$0xff] %v3412_v53  ;;  %v378_v10 = vmul.f32 %v3274_v27, %v3163_v18  ;;  %v673_v23 = vmul.f32 %v3282_v8, %v3166_v19  ;;  %v3423_v1 = vpop.f32.mrb[29].mxu0  ;;  %1761 = vmatprep.subr.bf16.mxu0 %v2514_v55 }
 0x131   :  { %v2643_v2 = vpop.eup %2642  ;;  %v672_v59 = vmul.f32 %v2641_v25, %v3201_v14  ;;  %2662 = vpow2.f32 %v3340_v58  ;;  %v3425_v45 = vpop.f32.mrb[29].mxu1  ;;  %v3433_v18 = vadd.f32 %v3263_v30, %v3116_v52  ;;  %v3437_v19 = vadd.f32 %v3265_v12, %v3116_v52 }
 0x132   :  { %v2645_v53 = vpop.eup %2644  ;;  %v392_v39 = vadd.f32 %v3317_v36, %v377_v54  ;;  %2664 = vpow2.f32 %v2041_v13  ;;  %v3439_v14 = vpop.f32.mrb[30].mxu0  ;;  %v379_v58 = vmul.f32 %v3296_v4, %v3177_v28  ;;  %v2512_v28 = vld [vmem:[%s3810_s8 + $0x60] ss:$8 sps:$4 sm:$0xff]   ;;  %v2077_v34 = vmul.f32 -1.442695, %v3408_v38 }
 0x133   :  { %v3441_v27 = vpop.f32.mrb[30].mxu1  ;;  %v2647_v8 = vpop.eup %2646  ;;  %v687_v36 = vadd.f32 %v3323_v46, %v672_v59  ;;  %2666 = vpow2.f32 %v2020_v20  ;;  %v2053_v20 = vmul.f32 -1.442695, %v3402_v62  ;;  %1762 = vmatpush1.bf16.msra.mxu0 %v2512_v28 }
 0x134   :  { %3832 = vst [vmem:[#allocation13_spill] sm:$0xff] %v3441_v27  ;;  %v3447_v13 = vpop.f32.mrb[31].mxu0  ;;  %v3449_v30 = vpop.f32.mrb[31].mxu1  ;;  %v393_v12 = vadd.f32 %v392_v39, %v378_v10  ;;  %v380_v54 = vmul.f32 %v2647_v8, %v3222_v37  ;;  %2668 = vpow2.f32 %v2044_v33  ;;  %v3454_v27 = vadd.f32 %v3116_v52, %v3270_v26  ;;  %v2517_v37 = vld [vmem:[%s3810_s8 + $0x74] ss:$8 sps:$4 sm:$0xff]  }
 0x135   :  { %v2649_v25 = vpop.eup %2648  ;;  %v688_v4 = vadd.f32 %v687_v36, %v673_v23  ;;  %2670 = vpow2.f32 %v2018_v24  ;;  %v2056_v10 = vmul.f32 -1.442695, %v3433_v18  ;;  %v3469_v8 = vpop.f32.mrb[32].mxu0  ;;  %1763 = vmatprep.subr.bf16.mxu0 %v2517_v37 }
 0x136   :  { %v2651_v6 = vpop.eup %2650  ;;  %v675_v46 = vmul.f32 %v2649_v25, %v3228_v40  ;;  %v394_v26 = vadd.f32 %v393_v12, %v379_v58  ;;  %2672 = vpow2.f32 %v2042_v17  ;;  %v2080_v40 = vmul.f32 -1.442695, %v3437_v19  ;;  %v2515_v17 = vld [vmem:[%s3810_s8 + $0x70] ss:$8 sps:$4 sm:$0xff]   ;;  %v2414_v25 = vpop.f32.mrb[33].mxu0 }
 0x137   :  { %v2653_v33 = vpop.eup %2652  ;;  %v689_v0 = vadd.f32 %v688_v4, %v674_v50  ;;  %2674 = vpow2.f32 %v2055_v44  ;;  %v2054_v55 = vmul.f32 -1.442695, %v3454_v27  ;;  %v677_v44 = vmul.f32 %v2645_v53, %v3214_v31  ;;  %1764 = vmatpush1.bf16.msra.mxu0 %v2515_v17 }
 0x138   :  { %v2655_v39 = vpop.eup %2654  ;;  %v395_v23 = vadd.f32 %v394_v26, %v380_v54  ;;  %2676 = vpow2.f32 %v2079_v60  ;;  %v382_v60 = vmul.f32 %v2643_v2, %v3206_v21  ;;  %v1414_v54 = vpop.f32.mrb[34].mxu0  ;;  %v678_v4 = vmul.f32 %v2653_v33, %v3235_v47 }
 0x139   :  { %v2657_v24 = vpop.eup %2656  ;;  %v381_v59 = vmul.f32 %v2655_v39, %v3239_v51  ;;  %v690_v50 = vadd.f32 %v689_v0, %v675_v46  ;;  %2678 = vpow2.f32 %v2053_v20  ;;  %v2415_v39 = vpop.f32.mrb[35].mxu0  ;;  %v383_v53 = vmul.f32 %v2651_v6, %v3231_v42 }
 0x13a   :  { %v3474_v58 = vpop.eup %2658  ;;  %v676_v36 = vmul.f32 %v2657_v24, %v3243_v48  ;;  %2680 = vpow2.f32 %v2077_v34  ;;  %v3489_v25 = vadd.f32 %v3299_v49, %v3116_v52  ;;  %v3502_v49 = vadd.f32 %v3116_v52, %v3308_v5 }
 0x13b   :  { %v3478_v51 = vpop.eup %2660  ;;  %v396_v12 = vadd.f32 %v395_v23, %v381_v59  ;;  %2682 = vpow2.f32 %v2056_v10  ;;  %v3515_v5 = vadd.f32 %v3116_v52, %v3319_v41 }
 0x13c   :  { %v2663_v28 = vpop.eup %2662  ;;  %v691_v26 = vadd.f32 %v690_v50, %v676_v36  ;;  %2684 = vpow2.f32 %v2080_v40  ;;  %v3485_v40 = vadd.f32 %v3116_v52, %v3272_v61  ;;  %v3494_v61 = vadd.f32 %v3301_v63, %v3116_v52 }
 0x13d   :  { %v2665_v31 = vpop.eup %2664  ;;  %v397_v48 = vadd.f32 %v396_v12, %v382_v60  ;;  %v336_v46 = vadd.f32 1.0, %v2663_v28  ;;  %2686 = vpow2.f32 %v2054_v55  ;;  %v3510_v63 = vadd.f32 %v3315_v29, %v3116_v52 }
 0x13e   :  { %v2667_v20 = vpop.eup %2666  ;;  %v692_v37 = vadd.f32 %v691_v26, %v677_v44  ;;  %v631_v0 = vadd.f32 1.0, %v2665_v31  ;;  %v2078_v54 = vmul.f32 -1.442695, %v3485_v40  ;;  %v3498_v26 = vadd.f32 %v3116_v52, %v3306_v22 }
 0x13f   :  { %v2669_v21 = vpop.eup %2668  ;;  %2688 = vrcp.f32 %v336_v46  ;;  %v398_v2 = vadd.f32 %v397_v48, %v383_v53  ;;  %v339_v34 = vadd.f32 1.0, %v2667_v20  ;;  %v3506_v53 = vadd.f32 %v3313_v15, %v3116_v52 }
 0x140   :  { %v2671_v24 = vpop.eup %2670  ;;  %2690 = vrcp.f32 %v631_v0  ;;  %v693_v47 = vadd.f32 %v692_v37, %v678_v4  ;;  %v634_v33 = vadd.f32 1.0, %v2669_v21  ;;  %v2059_v22 = vmul.f32 -1.442695, %v3489_v25 }
 0x141   :  { %v2673_v10 = vpop.eup %2672  ;;  %2692 = vrcp.f32 %v339_v34  ;;  %v337_v23 = vadd.f32 1.0, %v2671_v24  ;;  %v2083_v15 = vmul.f32 -1.442695, %v3494_v61  ;;  %v3521_v0 = vadd.f32 %v3116_v52, %v3321_v57 }
 0x142   :  { %v2675_v42 = vpop.eup %2674  ;;  %2694 = vrcp.f32 %v634_v33  ;;  %v632_v6 = vadd.f32 1.0, %v2673_v10  ;;  %v2057_v34 = vmul.f32 -1.442695, %v3498_v26  ;;  %v2081_v24 = vmul.f32 -1.442695, %v3502_v49 }
 0x143   :  { %v2677_v59 = vpop.eup %2676  ;;  %2696 = vrcp.f32 %v337_v23  ;;  %v921_v55 = vadd.f32 1.0, %v2675_v42  ;;  %v2084_v10 = vmul.f32 -1.442695, %v3510_v63  ;;  %v2058_v57 = vmul.f32 -1.442695, %v3515_v5 }
 0x144   :  { %v2679_v17 = vpop.eup %2678  ;;  %2698 = vrcp.f32 %v632_v6  ;;  %v1216_v44 = vadd.f32 1.0, %v2677_v59 }
 0x145   :  { %v2681_v50 = vpop.eup %2680  ;;  %2700 = vrcp.f32 %v921_v55  ;;  %v919_v36 = vadd.f32 1.0, %v2679_v17  ;;  %v3537_v55 = vadd.f32 %v3355_v35, %v3116_v52  ;;  %v3834_v35 = vld [vmem:[#allocation5_spill] sm:$0xff] }
 0x146   :  { %v2683_v60 = vpop.eup %2682  ;;  %2702 = vrcp.f32 %v1216_v44  ;;  %v1214_v12 = vadd.f32 1.0, %v2681_v50 }
 0x147   :  { %v2685_v28 = vpop.eup %2684  ;;  %2704 = vrcp.f32 %v919_v36  ;;  %v922_v4 = vadd.f32 1.0, %v2683_v60 }
 0x148   :  { %v2687_v39 = vpop.eup %2686  ;;  %2706 = vrcp.f32 %v1214_v12  ;;  %v1217_v31 = vadd.f32 1.0, %v2685_v28  ;;  %v3552_v12 = vadd.f32 %v3116_v52, %v3834_v35 }
 0x149   :  { %v2689_v48 = vpop.eup %2688  ;;  %2708 = vrcp.f32 %v922_v4  ;;  %v920_v46 = vadd.f32 1.0, %v2687_v39  ;;  %v3836_v4 = vld [vmem:[#allocation3_spill] sm:$0xff] }
 0x14a   :  { %v2691_v20 = vpop.eup %2690  ;;  %v384_v37 = vmul.f32 %v2689_v48, %v3327_v43  ;;  %2710 = vrcp.f32 %v1217_v31  ;;  %v2060_v43 = vmul.f32 -1.442695, %v3506_v53 }
 0x14b   :  { %v2693_v29 = vpop.eup %2692  ;;  %v679_v21 = vmul.f32 %v2691_v20, %v3337_v3  ;;  %2712 = vrcp.f32 %v920_v46  ;;  %v3531_v3 = vadd.f32 %v3346_v11, %v3116_v52  ;;  %v3544_v11 = vadd.f32 %v3116_v52, %v3357_v9 }
 0x14c   :  { %v2695_v41 = vpop.eup %2694  ;;  %v399_v33 = vadd.f32 %v398_v2, %v384_v37  ;;  %2714 = vpow2.f32 %v2078_v54  ;;  %v2082_v2 = vmul.f32 -1.442695, %v3521_v0  ;;  %v387_v39 = vmul.f32 %v2693_v29, %v3836_v4  ;;  %v3567_v29 = vld [vmem:[%s3809_s2] ss:$0 sm:$0xff] }
 0x14d   :  { %v2697_v23 = vpop.eup %2696  ;;  %v694_v42 = vadd.f32 %v693_v47, %v679_v21  ;;  %2716 = vpow2.f32 %v2059_v22  ;;  %v681_v47 = vmul.f32 %v3478_v51, %v3261_v7  ;;  %v3835_v7 = vld [vmem:[#allocation4_spill] sm:$0xff]  ;;  %v2063_v28 = vmul.f32 -1.442695, %v3531_v3 }
 0x14e   :  { %v2699_v6 = vpop.eup %2698  ;;  %v385_v59 = vmul.f32 %v2697_v23, %v3364_v56  ;;  %2718 = vpow2.f32 %v2083_v15  ;;  %v3833_v56 = vld [vmem:[#allocation2_spill] sm:$0xff]  ;;  %v682_v51 = vmul.f32 %v2695_v41, %v3835_v7  ;;  %v2061_v52 = vmul.f32 -1.442695, %v3544_v11  ;;  %v3838_v41 = vld [vmem:[#allocation7_spill] sm:$0xff] }
 0x14f   :  { %v2701_v17 = vpop.eup %2700  ;;  %v680_v44 = vmul.f32 %v2699_v6, %v3368_v32  ;;  %2720 = vpow2.f32 %v2057_v34  ;;  %v386_v36 = vmul.f32 %v3474_v58, %v3833_v56  ;;  %v2087_v58 = vmul.f32 -1.442695, %v3537_v55  ;;  %v3837_v34 = vld [vmem:[#allocation6_spill] sm:$0xff] }
 0x150   :  { %v3546_v50 = vpop.eup %2702  ;;  %v400_v60 = vadd.f32 %v399_v33, %v385_v59  ;;  %2722 = vpow2.f32 %v2081_v24  ;;  %v2085_v37 = vmul.f32 -1.442695, %v3552_v12  ;;  %v3571_v24 = vadd.f32 %v3567_v29, %v3837_v34  ;;  %v3839_v34 = vld [vmem:[#allocation8_spill] sm:$0xff] }
 0x151   :  { %v2705_v54 = vpop.eup %2704  ;;  %v695_v32 = vadd.f32 %v694_v42, %v680_v44  ;;  %2724 = vpow2.f32 %v2060_v43  ;;  %v3575_v33 = vadd.f32 %v3567_v29, %v3838_v41  ;;  %v969_v59 = vmul.f32 %v2701_v17, %v3377_v16 }
 0x152   :  { %v3556_v9 = vpop.eup %2706  ;;  %v401_v31 = vadd.f32 %v400_v60, %v386_v36  ;;  %2726 = vpow2.f32 %v2084_v10  ;;  %v967_v23 = vmul.f32 %v2705_v54, %v3402_v62  ;;  %v2064_v4 = vmul.f32 -1.442695, %v3571_v24 }
 0x153   :  { %v2709_v48 = vpop.eup %2708  ;;  %v696_v46 = vadd.f32 %v695_v32, %v681_v47  ;;  %2728 = vpow2.f32 %v2058_v57  ;;  %v3587_v41 = vadd.f32 %v3567_v29, %v3839_v34 }
 0x154   :  { %v3561_v22 = vpop.eup %2710  ;;  %v402_v20 = vadd.f32 %v401_v31, %v387_v39  ;;  %2730 = vpow2.f32 %v2082_v2  ;;  %v970_v7 = vmul.f32 %v2709_v48, %v3433_v18 }
 0x155   :  { %v2713_v15 = vpop.eup %2712  ;;  %v697_v21 = vadd.f32 %v696_v46, %v682_v51  ;;  %2732 = vpow2.f32 %v2063_v28 }
 0x156   :  { %v2715_v43 = vpop.eup %2714  ;;  %v403_v10 = vrot.slane %v402_v20, 4  ;;  %v968_v42 = vmul.f32 %v2713_v15, %v3454_v27  ;;  %2734 = vpow2.f32 %v2087_v58 }
 0x157   :  { %v2717_v57 = vpop.eup %2716  ;;  %v698_v6 = vrot.slane %v697_v21, 4  ;;  %v1215_v2 = vadd.f32 1.0, %v2715_v43  ;;  %2736 = vpow2.f32 %v2061_v52 }
 0x158   :  { %v2719_v47 = vpop.eup %2718  ;;  %v404_v44 = vadd.f32 %v403_v10, %v402_v20  ;;  %v983_v56 = vadd.f32 %v968_v42, %v967_v23  ;;  %v925_v36 = vadd.f32 1.0, %v2717_v57  ;;  %2738 = vpow2.f32 %v2085_v37  ;;  %v3840_v42 = vld [vmem:[#allocation10_spill] sm:$0xff] }
 0x159   :  { %v2721_v60 = vpop.eup %2720  ;;  %v699_v35 = vadd.f32 %v698_v6, %v697_v21  ;;  %2740 = vrcp.f32 %v1215_v2  ;;  %v1220_v62 = vadd.f32 1.0, %v2719_v47  ;;  %v2088_v20 = vmul.f32 -1.442695, %v3575_v33  ;;  %v3841_v47 = vld [vmem:[#allocation11_spill] sm:$0xff] }
 0x15a   :  { %v2723_v54 = vpop.eup %2722  ;;  %v405_v27 = vrot.slane %v404_v44, 2  ;;  %v984_v51 = vadd.f32 %v983_v56, %v969_v59  ;;  %2742 = vrcp.f32 %v925_v36  ;;  %v923_v32 = vadd.f32 1.0, %v2721_v60 }
 0x15b   :  { %v2725_v28 = vpop.eup %2724  ;;  %v700_v16 = vrot.slane %v699_v35, 2  ;;  %2744 = vrcp.f32 %v1220_v62  ;;  %v1218_v17 = vadd.f32 1.0, %v2723_v54  ;;  %v3591_v57 = vadd.f32 %v3567_v29, %v3840_v42 }
 0x15c   :  { %v2727_v39 = vpop.eup %2726  ;;  %v406_v31 = vadd.f32 %v405_v27, %v404_v44  ;;  %2746 = vrcp.f32 %v923_v32  ;;  %v3582_v58 = vadd.f32 %v984_v51, %v970_v7  ;;  %v926_v46 = vadd.f32 1.0, %v2725_v28 }
 0x15d   :  { %v2729_v18 = vpop.eup %2728  ;;  %v701_v48 = vadd.f32 %v700_v16, %v699_v35  ;;  %2748 = vrcp.f32 %v1218_v17  ;;  %v1221_v52 = vadd.f32 1.0, %v2727_v39  ;;  %v3595_v44 = vadd.f32 %v3567_v29, %v3841_v47  ;;  %v3842_v35 = vld [vmem:[#allocation12_spill] sm:$0xff] }
 0x15e   :  { %v2731_v37 = vpop.eup %2730  ;;  %v407_v15 = vrot.slane %v406_v31, 1  ;;  %2750 = vrcp.f32 %v926_v46  ;;  %v924_v21 = vadd.f32 1.0, %v2729_v18  ;;  %v3599_v7 = vadd.f32 %v3567_v29, %v3842_v35 }
 0x15f   :  { %v2733_v43 = vpop.eup %2732  ;;  %v702_v10 = vrot.slane %v701_v48, 1  ;;  %2752 = vrcp.f32 %v1221_v52  ;;  %v1219_v23 = vadd.f32 1.0, %v2731_v37  ;;  %v1262_v54 = vmul.f32 %v3556_v9, %v3408_v38 }
 0x160   :  { %v2735_v6 = vpop.eup %2734  ;;  %v408_v59 = vadd.f32 %v407_v15, %v406_v31  ;;  %2754 = vrcp.f32 %v924_v21  ;;  %v929_v2 = vadd.f32 1.0, %v2733_v43  ;;  %v2062_v51 = vmul.f32 -1.442695, %v3587_v41  ;;  %v3843_v31 = vld [vmem:[#allocation9_spill] sm:$0xff] }
 0x161   :  { %v2737_v56 = vpop.eup %2736  ;;  %v703_v36 = vadd.f32 %v702_v10, %v701_v48  ;;  %2756 = vrcp.f32 %v1219_v23  ;;  %v1224_v60 = vadd.f32 1.0, %v2735_v6  ;;  %v2086_v16 = vmul.f32 -1.442695, %v3591_v57  ;;  %v3844_v43 = vld [vmem:[#allocation13_spill] sm:$0xff] }
 0x162   :  { %v2739_v62 = vpop.eup %2738  ;;  %2758 = vrcp.f32 %v929_v2  ;;  %v927_v27 = vadd.f32 1.0, %v2737_v56  ;;  %v1264_v46 = vmul.f32 %v3546_v50, %v3843_v31  ;;  %v3612_v38 = vadd.f32 %v3567_v29, %v3423_v1 }
 0x163   :  { %v2741_v32 = vpop.eup %2740  ;;  %2760 = vrcp.f32 %v1224_v60  ;;  %v1222_v28 = vadd.f32 1.0, %v2739_v62  ;;  %v3605_v17 = vadd.f32 %v703_v36, %v408_v59  ;;  %v2067_v48 = vmul.f32 -1.442695, %v3595_v44 }
 0x164   :  { %v2743_v39 = vpop.eup %2742  ;;  %v1263_v18 = vmul.f32 %v2741_v32, %v3485_v40  ;;  %2762 = vrcp.f32 %v927_v27  ;;  %v2091_v52 = vmul.f32 -1.442695, %v3599_v7  ;;  %v3618_v37 = vadd.f32 %v3567_v29, %v3425_v45 }
 0x165   :  { %v2745_v9 = vpop.eup %2744  ;;  %2764 = vrcp.f32 %v1222_v28  ;;  %v1265_v50 = vmul.f32 %v3561_v22, %v3437_v19  ;;  %v3624_v1 = vadd.f32 %v3567_v29, %v3439_v14  ;;  %v3629_v10 = vadd.f32 %v3567_v29, %v3844_v43  ;;  %v2093_v19 = vld [vmem:[%s3811_s5] ss:$0 sm:$0xff] }
 0x166   :  { %v2747_v15 = vpop.eup %2746  ;;  %v1278_v40 = vadd.f32 %v1263_v18, %v1262_v54  ;;  %2766 = vpow2.f32 %v2064_v4  ;;  %v3633_v45 = vadd.f32 %v3567_v29, %v3447_v13  ;;  %v2089_v42 = vmul.f32 -1.442695, %v3618_v37 }
 0x167   :  { %v2749_v21 = vpop.eup %2748  ;;  %v971_v34 = vmul.f32 %v2747_v15, %v3498_v26  ;;  %2768 = vpow2.f32 %v2088_v20  ;;  %v2065_v26 = vmul.f32 -1.442695, %v3612_v38  ;;  %v3644_v13 = vadd.f32 %v3567_v29, %v3449_v30 }
 0x168   :  { %v2751_v22 = vpop.eup %2750  ;;  %v1279_v4 = vadd.f32 %v1278_v40, %v1264_v46  ;;  %v1266_v14 = vmul.f32 %v2749_v21, %v3502_v49  ;;  %2770 = vpow2.f32 %v2062_v51  ;;  %v2068_v2 = vmul.f32 -1.442695, %v3624_v1 }
 0x169   :  { %v2753_v20 = vpop.eup %2752  ;;  %v986_v23 = vadd.f32 %v3582_v58, %v971_v34  ;;  %2772 = vpow2.f32 %v2086_v16  ;;  %v3648_v49 = vadd.f32 %v2093_v19, %v3469_v8  ;;  %v2092_v58 = vmul.f32 -1.442695, %v3629_v10 }
 0x16a   :  { %v2755_v6 = vpop.eup %2754  ;;  %v1280_v59 = vadd.f32 %v1279_v4, %v1265_v50  ;;  %2774 = vpow2.f32 %v2067_v48  ;;  %v2066_v36 = vmul.f32 -1.442695, %v3633_v45  ;;  %v1268_v30 = vmul.f32 %v2745_v9, %v3494_v61 }
 0x16b   :  { %v2757_v47 = vpop.eup %2756  ;;  %v972_v56 = vmul.f32 %v2755_v6, %v3515_v5  ;;  %2776 = vpow2.f32 %v2091_v52  ;;  %v973_v8 = vmul.f32 %v2743_v39, %v3489_v25  ;;  %v2090_v5 = vmul.f32 -1.442695, %v3644_v13 }
 0x16c   :  { %v3653_v60 = vpop.eup %2758  ;;  %v1281_v29 = vadd.f32 %v1280_v59, %v1266_v14  ;;  %v1267_v35 = vmul.f32 %v2757_v47, %v3521_v0  ;;  %2778 = vpow2.f32 %v2065_v26  ;;  %v1269_v51 = vmul.f32 %v2753_v20, %v3510_v63 }
 0x16d   :  { %v3657_v62 = vpop.eup %2760  ;;  %v987_v54 = vadd.f32 %v986_v23, %v972_v56  ;;  %2780 = vpow2.f32 %v2089_v42  ;;  %v2102_v28 = vmul.f32 -1.442695, %v3648_v49  ;;  %v974_v16 = vmul.f32 %v2751_v22, %v3506_v53 }
 0x16e   :  { %v2763_v27 = vpop.eup %2762  ;;  %v1282_v32 = vadd.f32 %v1281_v29, %v1267_v35  ;;  %2782 = vpow2.f32 %v2068_v2 }
 0x16f   :  { %v2765_v61 = vpop.eup %2764  ;;  %v988_v0 = vadd.f32 %v987_v54, %v973_v8  ;;  %v975_v31 = vmul.f32 %v2763_v27, %v3544_v11  ;;  %2784 = vpow2.f32 %v2092_v58  ;;  %v1272_v27 = vmul.f32 %v3657_v62, %v3537_v55 }
 0x170   :  { %v2767_v46 = vpop.eup %2766  ;;  %v1283_v25 = vadd.f32 %v1282_v32, %v1268_v30  ;;  %v1270_v39 = vmul.f32 %v2765_v61, %v3552_v12  ;;  %2786 = vpow2.f32 %v2066_v36 }
 0x171   :  { %v2769_v18 = vpop.eup %2768  ;;  %v989_v9 = vadd.f32 %v988_v0, %v974_v16  ;;  %v930_v48 = vadd.f32 1.0, %v2767_v46  ;;  %2788 = vpow2.f32 %v2090_v5 }
 0x172   :  { %v2771_v63 = vpop.eup %2770  ;;  %v1284_v52 = vadd.f32 %v1283_v25, %v1269_v51  ;;  %v1225_v15 = vadd.f32 1.0, %v2769_v18  ;;  %2790 = vpow2.f32 %v2102_v28  ;;  %v977_v28 = vmul.f32 %v3653_v60, %v3531_v3 }
 0x173   :  { %v2773_v50 = vpop.eup %2772  ;;  %v990_v40 = vadd.f32 %v989_v9, %v975_v31  ;;  %2792 = vrcp.f32 %v930_v48  ;;  %v928_v53 = vadd.f32 1.0, %v2771_v63 }
 0x174   :  { %v2775_v21 = vpop.eup %2774  ;;  %v1285_v11 = vadd.f32 %v1284_v52, %v1270_v39  ;;  %2794 = vrcp.f32 %v1225_v15  ;;  %v1223_v34 = vadd.f32 1.0, %v2773_v50 }
 0x175   :  { %v2777_v43 = vpop.eup %2776  ;;  %2796 = vrcp.f32 %v928_v53  ;;  %v933_v12 = vadd.f32 1.0, %v2775_v21 }
 0x176   :  { %v2779_v19 = vpop.eup %2778  ;;  %2798 = vrcp.f32 %v1223_v34  ;;  %v1228_v22 = vadd.f32 1.0, %v2777_v43 }
 0x177   :  { %v2781_v4 = vpop.eup %2780  ;;  %2800 = vrcp.f32 %v933_v12  ;;  %v931_v14 = vadd.f32 1.0, %v2779_v19 }
 0x178   :  { %v2783_v26 = vpop.eup %2782  ;;  %2802 = vrcp.f32 %v1228_v22  ;;  %v1226_v20 = vadd.f32 1.0, %v2781_v4 }
 0x179   :  { %v2785_v23 = vpop.eup %2784  ;;  %2804 = vrcp.f32 %v931_v14  ;;  %v934_v42 = vadd.f32 1.0, %v2783_v26  ;;  %v59_v26 = vlaneseq }
 0x17a   :  { %v2787_v6 = vpop.eup %2786  ;;  %2806 = vrcp.f32 %v1226_v20  ;;  %v1229_v59 = vadd.f32 1.0, %v2785_v23 }
 0x17b   :  { %v2789_v2 = vpop.eup %2788  ;;  %2808 = vrcp.f32 %v934_v42  ;;  %v932_v47 = vadd.f32 1.0, %v2787_v6  ;;  %v3683_v42 = vshrl.u32 %v59_v26, 7 }
 0x17c   :  { %v2791_v56 = vpop.eup %2790  ;;  %2810 = vrcp.f32 %v1229_v59  ;;  %v1227_v58 = vadd.f32 1.0, %v2789_v2  ;;  %v706_v59 = vmul.f32 0.00390625, %v3605_v17  ;;  %v2518_v17 = vld [vmem:[%s3810_s8 + $0x80] ss:$8 sps:$4 sm:$0xff]  }
 0x17d   :  { %v2793_v36 = vpop.eup %2792  ;;  %2812 = vrcp.f32 %v932_v47  ;;  %v1420_v30 = vadd.f32 1.0, %v2791_v56  ;;  %vm705_vm1 = vcmp.eq.s32.totalorder %v3683_v42, 0  ;;  %vm1300_vm2 = vcmp.eq.s32.totalorder %v3683_v42, 1 }
 0x17e   :  { %v2795_v29 = vpop.eup %2794  ;;  %2814 = vrcp.f32 %v1227_v58  ;;  %v978_v25 = vmul.f32 %v2793_v36, %v3571_v24  ;;  %v709_v56 = vsel %vm705_vm1, %v706_v59, 0.0  ;;  %v2520_v36 = vld [vmem:[%s3810_s8 + $0x84] ss:$8 sps:$4 sm:$0xff]  }
 0x17f   :  { %v2797_v35 = vpop.eup %2796  ;;  %2816 = vrcp.f32 %v1420_v30  ;;  %v1273_v0 = vmul.f32 %v2795_v29, %v3575_v33  ;;  %1765 = vmatprep.subr.bf16.mxu0 %v2520_v36  ;;  %v2523_v30 = vld [vmem:[%s3810_s8 + $0x94] ss:$8 sps:$4 sm:$0xff]   ;;  %v2521_v29 = vld [vmem:[%s3810_s8 + $0x90] ss:$8 sps:$4 sm:$0xff]  }
 0x180   :  { %v2799_v8 = vpop.eup %2798  ;;  %v976_v54 = vmul.f32 %v2797_v35, %v3587_v41  ;;  %1766 = vmatpush1.bf16.msra.mxu0 %v2518_v17  ;;  %v2526_v35 = vld [vmem:[%s3810_s8 + $0xa4] ss:$8 sps:$4 sm:$0xff]  }
 0x181   :  { %v2801_v5 = vpop.eup %2800  ;;  %v1271_v51 = vmul.f32 %v2799_v8, %v3591_v57  ;;  %1767 = vmatprep.subr.bf16.mxu0 %v2523_v30  ;;  %v2524_v8 = vld [vmem:[%s3810_s8 + $0xa0] ss:$8 sps:$4 sm:$0xff]  }
 0x182   :  { %v2803_v32 = vpop.eup %2802  ;;  %v991_v61 = vadd.f32 %v990_v40, %v976_v54  ;;  %v2529_v54 = vld [vmem:[%s3810_s8 + $0xb4] ss:$8 sps:$4 sm:$0xff]  }
 0x183   :  { %v2805_v16 = vpop.eup %2804  ;;  %v1286_v31 = vadd.f32 %v1285_v11, %v1271_v51  ;;  %v1276_v15 = vmul.f32 %v2803_v32, %v3599_v7  ;;  %v2530_v51 = vld [vmem:[%s3810_s8 + $0xc0] ss:$8 sps:$4 sm:$0xff]   ;;  %v2535_v32 = vld [vmem:[%s3810_s8 + $0xd4] ss:$8 sps:$4 sm:$0xff]  }
 0x184   :  { %v2807_v46 = vpop.eup %2806  ;;  %v992_v39 = vadd.f32 %v991_v61, %v977_v28  ;;  %v979_v41 = vmul.f32 %v2805_v16, %v3612_v38  ;;  %v981_v38 = vmul.f32 %v2801_v5, %v3595_v44  ;;  %1768 = vmatpush1.bf16.msra.mxu0 %v2521_v29  ;;  %v2527_v5 = vld [vmem:[%s3810_s8 + $0xb0] ss:$8 sps:$4 sm:$0xff]   ;;  %v2538_v61 = vld [vmem:[%s3810_s8 + $0xe4] ss:$8 sps:$4 sm:$0xff]   ;;  %v2536_v16 = vld [vmem:[%s3810_s8 + $0xe0] ss:$8 sps:$4 sm:$0xff]  }
 0x185   :  { %v2809_v18 = vpop.eup %2808  ;;  %v1287_v9 = vadd.f32 %v1286_v31, %v1272_v27  ;;  %v1274_v55 = vmul.f32 %v2807_v46, %v3618_v37  ;;  %1769 = vmatprep.subr.bf16.mxu0 %v2526_v35  ;;  %v2532_v27 = vld [vmem:[%s3810_s8 + $0xc4] ss:$8 sps:$4 sm:$0xff]   ;;  %v2533_v28 = vld [vmem:[%s3810_s8 + $0xd0] ss:$8 sps:$4 sm:$0xff]   ;;  %v2541_v31 = vld [vmem:[%s3810_s8 + $0xf4] ss:$8 sps:$4 sm:$0xff]  }
 0x186   :  { %v2811_v57 = vpop.eup %2810  ;;  %v993_v62 = vadd.f32 %v992_v39, %v978_v25  ;;  %v982_v11 = vmul.f32 %v2809_v18, %v3624_v1  ;;  %v2103_v46 = vld [vmem:[%s3813_s7] ss:$0 sm:$0xff] }
 0x187   :  { %v2813_v48 = vpop.eup %2812  ;;  %v1288_v63 = vadd.f32 %v1287_v9, %v1273_v0  ;;  %v1277_v37 = vmul.f32 %v2811_v57, %v3629_v10  ;;  %v2539_v0 = vld [vmem:[%s3810_s8 + $0xf0] ss:$8 sps:$4 sm:$0xff]  }
 0x188   :  { %v2815_v3 = vpop.eup %2814  ;;  %v994_v60 = vadd.f32 %v993_v62, %v979_v41  ;;  %v980_v52 = vmul.f32 %v2813_v48, %v3633_v45  ;;  %1770 = vmatpush1.bf16.msra.mxu0 %v2524_v8  ;;  %v2147_v8 = vld [vmem:[%s3816_s11] ss:$0 sm:$0xff] }
 0x189   :  { %v2817_v33 = vpop.eup %2816  ;;  %v1289_v50 = vadd.f32 %v1288_v63, %v1274_v55  ;;  %v1275_v24 = vmul.f32 %v2815_v3, %v3644_v13  ;;  %1771 = vmatprep.subr.bf16.mxu0 %v2529_v54 }
 0x18a   :  { %v995_v40 = vadd.f32 %v994_v60, %v980_v52  ;;  %v1423_v53 = vmul.f32 %v2817_v33, %v3648_v49  ;;  %v2542_v52 = vld [vmem:[%s3814_s10 + $0x40] sm:$0xff]  }
 0x18b   :  { %v1290_v21 = vadd.f32 %v1289_v50, %v1275_v24  ;;  %v2543_v33 = vld [vmem:[%s3814_s10] sm:$0xff]   ;;  %2246 = vmatprep.subr.bf16.mxu1 %v2542_v52  ;;  %v2545_v50 = vld [vmem:[%s3814_s10 + $0x8] sm:$0xff]   ;;  %v2546_v24 = vld [vmem:[%s3814_s10 + $0x50] sm:$0xff]  }
 0x18c   :  { %v996_v34 = vadd.f32 %v995_v40, %v981_v38  ;;  %v1424_v43 = vpack.c.bf16 %v1423_v53, %v1423_v53  ;;  %1772 = vmatpush1.bf16.msra.mxu0 %v2527_v5  ;;  %v2547_v38 = vld [vmem:[%s3814_s10 + $0x10] sm:$0xff]   ;;  %v2548_v40 = vld [vmem:[%s3814_s10 + $0x58] sm:$0xff]  }
 0x18d   :  { %v1291_v12 = vadd.f32 %v1290_v21, %v1276_v15  ;;  %1773 = vmatprep.subr.bf16.mxu0 %v2532_v27  ;;  %v2544_v15 = vld [vmem:[%s3814_s10 + $0x48] sm:$0xff]   ;;  %v2549_v53 = vld [vmem:[%s3814_s10 + $0x18] sm:$0xff]   ;;  %v2551_v21 = vld [vmem:[%s3814_s10 + $0x20] sm:$0xff]  }
 0x18e   :  { %v997_v45 = vadd.f32 %v996_v34, %v982_v11  ;;  %2433 = vmatmul.mubr.bf16.vlgmr.msra.gmra.mrb[32].mxu1 %v1424_v43  ;;  %v2552_v11 = vld [vmem:[%s3814_s10 + $0x68] sm:$0xff]   ;;  %v2554_v43 = vld [vmem:[%s3814_s10 + $0x70] sm:$0xff]  }
 0x18f   :  { %v1292_v19 = vadd.f32 %v1291_v12, %v1277_v37  ;;  %2247 = vmatpush3.bf16.msra.mxu1 %v2543_v33  ;;  %v2550_v37 = vld [vmem:[%s3814_s10 + $0x60] sm:$0xff]   ;;  %v2553_v34 = vld [vmem:[%s3814_s10 + $0x28] sm:$0xff]   ;;  %v2555_v12 = vld [vmem:[%s3814_s10 + $0x30] sm:$0xff]  }
 0x190   :  { %v998_v7 = vrot.slane %v997_v45, 4  ;;  %1774 = vmatpush1.bf16.msra.mxu0 %v2530_v51  ;;  %2248 = vmatprep.subr.bf16.mxu1 %v2544_v15 }
 0x191   :  { %v1293_v22 = vrot.slane %v1292_v19, 4  ;;  %1775 = vmatprep.subr.bf16.mxu0 %v2535_v32 }
 0x192   :  { %v999_v4 = vadd.f32 %v998_v7, %v997_v45  ;;  %v2556_v45 = vld [vmem:[%s3814_s10 + $0x78] sm:$0xff]   ;;  %v1581_v7 = vsub.s32 0, %v3683_v42 }
 0x193   :  { %v1294_v13 = vadd.f32 %v1293_v22, %v1292_v19  ;;  %2249 = vmatpush3.bf16.msra.mxu1 %v2545_v50  ;;  %v2557_v19 = vld [vmem:[%s3814_s10 + $0x38] sm:$0xff]   ;;  %v1577_v22 = vld [vmem:[%s3815_s9] sm:$0x3] }
 0x194   :  { %v1000_v14 = vrot.slane %v999_v4, 2  ;;  %1776 = vmatpush1.bf16.msra.mxu0 %v2533_v28  ;;  %2250 = vmatprep.subr.bf16.mxu1 %v2546_v24 }
 0x195   :  { %v1295_v44 = vrot.slane %v1294_v13, 2  ;;  %1777 = vmatprep.subr.bf16.mxu0 %v2538_v61 }
 0x196   :  { %v1001_v20 = vadd.f32 %v1000_v14, %v999_v4  ;;  %v1585_v4 = vsub.s32 1, %v3683_v42 }
 0x197   :  { %v1296_v49 = vadd.f32 %v1295_v44, %v1294_v13  ;;  %2251 = vmatpush3.bf16.msra.mxu1 %v2547_v38  ;;  %v1582_v13 = vrot.slane %v1577_v22, %v1581_v7 }
 0x198   :  { %v1002_v23 = vrot.slane %v1001_v20, 1  ;;  %1778 = vmatpush1.bf16.msra.mxu0 %v2536_v16  ;;  %2252 = vmatprep.subr.bf16.mxu1 %v2548_v40  ;;  %v1586_v14 = vrot.slane %v1577_v22, %v1585_v4 }
 0x199   :  { %v1297_v10 = vrot.slane %v1296_v49, 1  ;;  %1779 = vmatprep.subr.bf16.mxu0 %v2541_v31 }
 0x19a   :  { %v1003_v1 = vadd.f32 %v1002_v23, %v1001_v20 }
 0x19b   :  { %v1298_v6 = vadd.f32 %v1297_v10, %v1296_v49  ;;  %2253 = vmatpush3.bf16.msra.mxu1 %v2549_v53 }
 0x19c   :  { %1780 = vmatpush1.bf16.msra.mxu0 %v2539_v0  ;;  %2254 = vmatprep.subr.bf16.mxu1 %v2550_v37 }
 0x19d   :  { %v1299_v2 = vadd.f32 %v1298_v6, %v1003_v1 }
 0x19f   :  { %v1301_v47 = vmul.f32 0.00390625, %v1299_v2  ;;  %2255 = vmatpush3.bf16.msra.mxu1 %v2551_v21 }
 0x1a0   :  { %2256 = vmatprep.subr.bf16.mxu1 %v2552_v11 }
 0x1a1   :  { %v1304_v58 = vsel %vm1300_vm2, %v1301_v47, %v709_v56 }
 0x1a2   :  { %1981 = vst [vmem:[%s3812_s12] sm:$0xff] %v1304_v58  ;;  %v1543_v60 = vpack.c.bf16 %v1304_v58, %v1304_v58 }
 0x1a3   :  { %2257 = vmatpush3.bf16.msra.mxu1 %v2553_v34 }
 0x1a4   :  { %2258 = vmatprep.subr.bf16.mxu1 %v2554_v43 }
 0x1a7   :  { %2259 = vmatpush3.bf16.msra.mxu1 %v2555_v12 }
 0x1a8   :  { %2260 = vmatprep.subr.bf16.mxu1 %v2556_v45 }
 0x1ab   :  { %2261 = vmatpush3.bf16.msra.mxu1 %v2557_v19 }
 0x261   :  { %v1530_v25 = vpop.f32.mrb[32].mxu1 }
 0x262   :  { %v1531_v39 = vadd.f32 %v2103_v46, %v1530_v25  ;;  %v2434_v41 = vpop.f32.mrb[33].mxu1 }
 0x263   :  { %v1533_v18 = vpop.f32.mrb[34].mxu1 }
 0x264   :  { %v2112_v9 = vmul.f32 -1.442695, %v1531_v39  ;;  %v2435_v55 = vpop.f32.mrb[35].mxu1 }
 0x266   :  { %2818 = vpow2.f32 %v2112_v9 }
 0x270   :  { %v2819_v57 = vpop.eup %2818 }
 0x271   :  { %v1539_v62 = vadd.f32 1.0, %v2819_v57 }
 0x273   :  { %2820 = vrcp.f32 %v1539_v62 }
 0x27d   :  { %v2821_v48 = vpop.eup %2820 }
 0x27e   :  { %v1542_v63 = vmul.f32 %v2821_v48, %v1531_v39 }
 0x280   :  { %1982 = vst [vmem:[%s3812_s12 + $0x8] sm:$0xff] %v1542_v63  ;;  %v1544_v3 = vpack.c.bf16 %v1542_v63, %v1542_v63 }
 0x282   :  { %1781 = vmatprep.mubr.bf16.mxu0 %v1544_v3 }
 0x283   :  { %1782 = vmatmul.mubr.bf16.vlgmr.msra.gmra.mrb[36].mxu0 %v1543_v60 }
 0x356   :  { %v1783_v44 = vpop.f32.mrb[36].mxu0 }
 0x357   :  { %v1784_v26 = vadd.f32 %v1783_v44, %v1582_v13  ;;  %v1785_v20 = vpop.f32.mrb[37].mxu0 }
 0x358   :  { %v1786_v49 = vadd.f32 %v1785_v20, %v1586_v14  ;;  %v1787_v23 = vpop.f32.mrb[38].mxu0 }
 0x359   :  { %v2145_v10 = vmul.f32 -1.442695, %v1784_v26  ;;  %v1788_v1 = vpop.f32.mrb[39].mxu0 }
 0x35a   :  { %v2146_v6 = vmul.f32 -1.442695, %v1786_v49 }
 0x35b   :  { %2822 = vpow2.f32 %v2145_v10 }
 0x35c   :  { %2824 = vpow2.f32 %v2146_v6 }
 0x365   :  { %v2823_v59 = vpop.eup %2822 }
 0x366   :  { %v2825_v2 = vpop.eup %2824  ;;  %v1796_v47 = vadd.f32 1.0, %v2823_v59 }
 0x367   :  { %v1797_v56 = vadd.f32 1.0, %v2825_v2 }
 0x368   :  { %2826 = vrcp.f32 %v1796_v47 }
 0x369   :  { %2828 = vrcp.f32 %v1797_v56 }
 0x372   :  { %v2827_v58 = vpop.eup %2826 }
 0x373   :  { %v2829_v42 = vpop.eup %2828  ;;  %v1802_v36 = vmul.f32 %v2827_v58, %v1784_v26 }
 0x374   :  { %v1803_v17 = vmul.f32 %v2829_v42, %v1786_v49 }
 0x375   :  { %v1804_v29 = vpack.c.bf16 %v1802_v36, %v1802_v36 }
 0x376   :  { %v1805_v30 = vpack.c.bf16 %v1803_v17, %v1803_v17 }
 0x378   :  { %1973 = vmatprep.mubr.bf16.mxu1 %v1805_v30 }
 0x379   :  { %1974 = vmatmul.mubr.bf16.vlgmr.msra.gmra.mrb[36].mxu1 %v1804_v29 }
 0x44c   :  { %v2262_v35 = vpop.f32.mrb[36].mxu1 }
 0x44d   :  { %v2263_v54 = vpop.f32.mrb[37].mxu1 }
 0x44e   :  { %v2264_v5 = vadd.f32 %v2263_v54, %v2262_v35  ;;  %v2265_v27 = vpop.f32.mrb[38].mxu1 }
 0x44f   :  { %v2266_v51 = vpop.f32.mrb[39].mxu1 }
 0x450   :  { %v1976_v32 = vadd.f32 %v2264_v5, %v2147_v8 }
 0x452   :  { %1983 = vst [vmem:[%s3812_s12 + $0x10] sm:$0xff] %v1976_v32 }

</bundles_post_ra>
